<compile_context>
chip_gen: v6e
topology: v6e:2x2x1
jax: 0.10.0
libtpu: 0.0.40
codegen_flags: <defaults>
</compile_context>

<pallas_src>
import itertools

import numpy as np
import jax
import jax.numpy as jnp
from jax.experimental import pallas as pl
from jax.experimental.pallas import tpu as pltpu

# ---------------- static configuration ----------------
N_CHEB = 3
N_ELEM = 2
N_CH = 8            # radial_fn.n_channel == spin_radial_fn.n_channel
D_IN = 8            # input_dim
D_OUT = 8           # output_dim
MIX = N_CHEB * D_OUT
GAMMA_R = 4.0
GAMMA_S = 4.0
TE = 128            # edge tile (lane axis); sweep 128-512 for production sizes

MAX_IN_WAY = MAX_R_WAY = MAX_OUT_WAY = 2
N_EDGE_ROWS = 4 + 2 * N_ELEM + 3          # dij, mi_i, mi_j, sij, oh_i, oh_j, uij
N_NODE_ROWS = (1 + 3 + 9) * D_IN          # ways 0,1,2 spatial-major

TP_COMBOS = [        # (x_way, y_way, z_way); x_way + y_way - z_way must be even
    (0, 0, 0), (1, 1, 0), (2, 2, 0),
    (0, 1, 1), (1, 0, 1), (1, 2, 1), (2, 1, 1),
    (0, 2, 2), (2, 0, 2), (1, 1, 2), (2, 2, 2),
]
N_COMBO = len(TP_COMBOS)
COMBOS_BY_ZW = {zw: [ci for ci, c in enumerate(TP_COMBOS) if c[2] == zw]
                for zw in range(MAX_OUT_WAY + 1)}


def _sidx(way):
    return list(itertools.product(range(3), repeat=way))


# ---------------- Pallas kernel ----------------
def spinconv_kernel(edge_ref, node_ref, mu_r_ref, mu_s_ref,
                    w_rbf_ref, w_spin_ref, wu_ref, bu0_ref, wv_ref,
                    wz0_ref, wz1_ref, wz2_ref,
                    z0_ref, z1_ref, z2_ref):
    f32 = jnp.float32
    bf16 = jnp.bfloat16

    edge = edge_ref[...]                       # [11, TE] f32
    te = edge.shape[1]
    dij = edge[0:1, :]
    mi_i = edge[1:2, :]
    mi_j = edge[2:3, :]
    sij = edge[3:4, :]
    oh_i = edge[4:4 + N_ELEM, :]
    oh_j = edge[4 + N_ELEM:4 + 2 * N_ELEM, :]
    uij = edge[4 + 2 * N_ELEM:4 + 2 * N_ELEM + 3, :]     # [3, TE]

    # --- radial / spin bases (Gaussian smearing) -> EUP ---
    rbf = jnp.exp(-GAMMA_R * (dij - mu_r_ref[...]) ** 2)       # [N_CH, TE]
    srbf_i = jnp.exp(-GAMMA_S * (mi_i - mu_s_ref[...]) ** 2)
    srbf_j = jnp.exp(-GAMMA_S * (mi_j - mu_s_ref[...]) ** 2)

    def mask_by_element(basis, oh):
        # stack element-masked copies along K -> [N_ELEM*N_CH, TE]
        return jnp.concatenate([basis * oh[el:el + 1, :] for el in range(N_ELEM)],
                               axis=0)

    def dot(w, x):
        # MXU-native: bf16 operands, f32 accumulation
        return jnp.dot(w.astype(bf16), x.astype(bf16), preferred_element_type=f32)

    # --- fused ElementLinear mixings, all 3 ways at once ---
    rbf_mix = dot(w_rbf_ref[...], mask_by_element(rbf, oh_i))     # [3*MIX, TE]
    sb_i = dot(w_spin_ref[...], mask_by_element(srbf_i, oh_i))    # [3*MIX, TE]
    sb_j = dot(w_spin_ref[...], mask_by_element(srbf_j, oh_j))    # [3*MIX, TE]
    hehe = rbf_mix * sb_i * sb_j

    # --- Chebyshev T0..T2 of s_i.s_j, hoisted into one row-pattern multiply ---
    t2 = 2.0 * sij * sij - 1.0
    cheb_block = jnp.concatenate(
        [jnp.ones((D_OUT, te), f32),
         jnp.broadcast_to(sij, (D_OUT, te)),
         jnp.broadcast_to(t2, (D_OUT, te))], axis=0)              # [MIX, TE]
    cheb_full = jnp.concatenate([cheb_block] * (MAX_R_WAY + 1), axis=0)
    xixi = hehe * cheb_full                                       # [3*MIX, TE]

    # --- V: block-diag over ways, one dot -> [3*D_OUT, TE] ---
    v_all = dot(wv_ref[...], xixi)

    # --- U: block-diag over (way, spatial), one dot -> [13*D_OUT, TE] ---
    u_all = dot(wu_ref[...], node_ref[...])

    x_chunks = {0: {(): u_all[0:D_OUT, :] + bu0_ref[...]}}
    off = D_OUT
    for way in (1, 2):
        x_chunks[way] = {}
        for n, idx in enumerate(_sidx(way)):
            x_chunks[way][idx] = u_all[off + n * D_OUT: off + (n + 1) * D_OUT, :]
        off += (3 ** way) * D_OUT

    # --- r[way] moments: factorized V * prod(uij components) ---
    y_chunks = {}
    for way in range(MAX_R_WAY + 1):
        vw = v_all[way * D_OUT:(way + 1) * D_OUT, :]
        y_chunks[way] = {}
        for idx in _sidx(way):
            m = None
            for a in idx:
                ua = uij[a:a + 1, :]
                m = ua if m is None else m * ua
            y_chunks[way][idx] = vw if m is None else vw * m

    # --- tensor product + per-z_way fused channel mixing (3 dots, 1 store each) ---
    wz_refs = {0: wz0_ref, 1: wz1_ref, 2: wz2_ref}
    z_refs = {0: z0_ref, 1: z1_ref, 2: z2_ref}
    for zw in range(MAX_OUT_WAY + 1):
        parts = []   # VMEM-staged rhs slab: zi-major, combo-minor
        for zi in _sidx(zw):
            for ci in COMBOS_BY_ZW[zw]:
                xw, yw, _ = TP_COMBOS[ci]
                k = (xw + yw - zw) // 2
                xf = xw - k
                xi, yi = zi[:xf], zi[xf:]
                acc = None
                for ct in _sidx(k):
                    t = x_chunks[xw][xi + ct] * y_chunks[yw][yi + ct]
                    acc = t if acc is None else acc + t
                parts.append(acc)
        rhs = jnp.concatenate(parts, axis=0) if len(parts) > 1 else parts[0]
        z_refs[zw][...] = dot(wz_refs[zw][...], rhs)


# ---------------- wrapper (glue: gathers, layout, pallas_call) ----------------
def _block_diag(blocks):
    rows = sum(b.shape[0] for b in blocks)
    cols = sum(b.shape[1] for b in blocks)
    out = jnp.zeros((rows, cols), blocks[0].dtype)
    r = c = 0
    for b in blocks:
        out = out.at[r:r + b.shape[0], c:c + b.shape[1]].set(b)
        r += b.shape[0]
        c += b.shape[1]
    return out


def spin_conv_layer(node_info, edge_info, batch_data, params):
    del edge_info   # unused, same as the PyTorch forward
    idx_i = batch_data['idx_i']
    idx_j = batch_data['idx_j']
    pos = batch_data['coordinate']
    spin = batch_data['spin']
    spec = batch_data['species']
    ne = idx_i.shape[0]
    ne_pad = TE * pl.cdiv(ne, TE)
    pad = ne_pad - ne

    # find_distances / find_spin
    rij = pos[idx_j] - pos[idx_i]
    dij = jnp.sqrt(jnp.sum(rij * rij, axis=-1))              # [NE]
    uij = rij / dij[:, None]
    mi = jnp.sqrt(jnp.sum(spin * spin, axis=-1))             # [NA]
    si = spin / mi[:, None]
    sij = jnp.sum(si[idx_i] * si[idx_j], axis=-1)            # [NE]
    onehot = jax.nn.one_hot(spec, N_ELEM, dtype=jnp.float32)

    # one consolidated per-edge slab: [11, NE]
    edge_slab = jnp.concatenate(
        [dij[None, :], mi[idx_i][None, :], mi[idx_j][None, :], sij[None, :],
         onehot[idx_i].T, onehot[idx_j].T, uij.T], axis=0)

    # one consolidated node-feature slab (gathered at idx_j), spatial-major rows
    n0 = node_info[0][idx_j].T                                            # [D_IN, NE]
    n1 = jnp.transpose(node_info[1][idx_j], (2, 1, 0)).reshape(3 * D_IN, ne)
    n2 = jnp.transpose(node_info[2][idx_j], (2, 3, 1, 0)).reshape(9 * D_IN, ne)
    node_slab = jnp.concatenate([n0, n1, n2], axis=0)                     # [104, NE]

    if pad:
        edge_slab = jnp.pad(edge_slab, ((0, 0), (0, pad)))
        node_slab = jnp.pad(node_slab, ((0, 0), (0, pad)))
    node_slab = node_slab.astype(jnp.bfloat16)

    # ---- weight slabs (host-side layout plumbing; MXU operands in bf16) ----
    bf16 = jnp.bfloat16
    # fused ElementLinear weights: rows = (way, cheb*D_OUT), cols = (elem, channel)
    w_rbf_f = jnp.transpose(params['w_rbf'], (0, 3, 1, 2)).reshape(
        (MAX_R_WAY + 1) * MIX, N_ELEM * N_CH).astype(bf16)
    w_spin_f = jnp.transpose(params['w_spin'], (0, 3, 1, 2)).reshape(
        (MAX_R_WAY + 1) * MIX, N_ELEM * N_CH).astype(bf16)
    wv_bd = _block_diag([params['wv'][w].T for w in range(MAX_R_WAY + 1)]).astype(bf16)
    wu_bd = _block_diag([params['wu'][0].T]
                        + [params['wu'][1].T] * 3
                        + [params['wu'][2].T] * 9).astype(bf16)           # [104, 104]
    bu0 = params['bu0'].reshape(D_OUT, 1)

    def build_wz(zw):
        per_zi = jnp.concatenate([params['wtp'][ci].T for ci in COMBOS_BY_ZW[zw]],
                                 axis=1)                                  # [D_OUT, n_c*D_OUT]
        n_zi = 3 ** zw
        w = per_zi if n_zi == 1 else _block_diag([per_zi] * n_zi)
        return w.astype(bf16)

    wz0, wz1, wz2 = build_wz(0), build_wz(1), build_wz(2)
    mu_r = params['mu_r'].reshape(N_CH, 1)
    mu_s = params['mu_s'].reshape(N_CH, 1)

    def edge_spec(rows):
        return pl.BlockSpec((rows, TE), lambda e: (0, e))

    def full_spec(shape):
        nd = len(shape)
        return pl.BlockSpec(shape, lambda e, _nd=nd: (0,) * _nd)

    out_shape = (
        jax.ShapeDtypeStruct((D_OUT, ne_pad), jnp.float32),
        jax.ShapeDtypeStruct((3 * D_OUT, ne_pad), jnp.float32),
        jax.ShapeDtypeStruct((9 * D_OUT, ne_pad), jnp.float32),
    )
    z0, z1, z2 = pl.pallas_call(
        spinconv_kernel,
        out_shape=out_shape,
        grid_spec=pltpu.PrefetchScalarGridSpec(
            num_scalar_prefetch=0,
            grid=(ne_pad // TE,),
            in_specs=[
                edge_spec(N_EDGE_ROWS), edge_spec(N_NODE_ROWS),
                full_spec(mu_r.shape), full_spec(mu_s.shape),
                full_spec(w_rbf_f.shape), full_spec(w_spin_f.shape),
                full_spec(wu_bd.shape), full_spec(bu0.shape), full_spec(wv_bd.shape),
                full_spec(wz0.shape), full_spec(wz1.shape), full_spec(wz2.shape),
            ],
            out_specs=[edge_spec(D_OUT), edge_spec(3 * D_OUT), edge_spec(9 * D_OUT)],
        ),
        # grid axis is per-edge-tile independent; on v7x size ne/TE to a multiple
        # of 2 so both TensorCores stay busy.
        compiler_params=pltpu.CompilerParams(dimension_semantics=("parallel",)),
    )(edge_slab, node_slab, mu_r, mu_s, w_rbf_f, w_spin_f,
      wu_bd, bu0, wv_bd, wz0, wz1, wz2)

    # drop padded edges and restore the PyTorch [NE, channels, 3, ..., 3] convention
    z0 = z0[:, :ne]
    z1 = z1[:, :ne]
    z2 = z2[:, :ne]
    out0 = z0.T
    out1 = jnp.transpose(z1.reshape(3, D_OUT, ne), (2, 1, 0))
    out2 = jnp.transpose(z2.reshape(3, 3, D_OUT, ne), (3, 2, 0, 1))
    return {0: out0, 1: out1, 2: out2}


# ---------------- deterministic parameter init ----------------
def init_params(key):
    ks = jax.random.split(key, 6)
    s = 0.5
    return {
        'mu_r': jnp.linspace(0.0, 3.0, N_CH, dtype=jnp.float32).reshape(1, N_CH),
        'mu_s': jnp.linspace(0.0, 2.0, N_CH, dtype=jnp.float32).reshape(1, N_CH),
        'w_rbf': s * jax.random.normal(ks[0], (MAX_R_WAY + 1, N_ELEM, N_CH, MIX), jnp.float32),
        'w_spin': s * jax.random.normal(ks[1], (MAX_R_WAY + 1, N_ELEM, N_CH, MIX), jnp.float32),
        'wu': s * jax.random.normal(ks[2], (MAX_IN_WAY + 1, D_IN, D_OUT), jnp.float32),
        'bu0': s * jax.random.normal(ks[3], (1, D_OUT), jnp.float32),
        'wv': s * jax.random.normal(ks[4], (MAX_R_WAY + 1, MIX, D_OUT), jnp.float32),
        'wtp': s * jax.random.normal(ks[5], (N_COMBO, D_OUT, D_OUT), jnp.float32),
    }


# ---------------- pure-JAX reference (same semantics & matmul rounding) ----------------
def _mm(eq, a, b):
    # Same numerics as the kernel's MXU dots (bf16-rounded operands, f32
    # accumulation: bf16*bf16 products are exact in f32), but contracted as a
    # plain f32 einsum so it also executes on backends whose dot runtime does
    # not support the BF16 x BF16 = F32 combination (the previous failure).
    f32 = jnp.float32
    a32 = a.astype(jnp.bfloat16).astype(f32)
    b32 = b.astype(jnp.bfloat16).astype(f32)
    return jnp.einsum(eq, a32, b32, preferred_element_type=f32)


def spin_conv_reference(node_info, batch_data, params):
    idx_i = batch_data['idx_i']; idx_j = batch_data['idx_j']
    pos = batch_data['coordinate']; spin = batch_data['spin']; spec = batch_data['species']
    ne = idx_i.shape[0]
    rij = pos[idx_j] - pos[idx_i]
    dij = jnp.sqrt(jnp.sum(rij ** 2, -1, keepdims=True))
    uij = rij / dij
    mi = jnp.sqrt(jnp.sum(spin ** 2, -1, keepdims=True))
    si = spin / mi
    sij = jnp.sum(si[idx_i] * si[idx_j], -1)
    rbf = jnp.exp(-GAMMA_R * (dij - params['mu_r']) ** 2)
    srbf = jnp.exp(-GAMMA_S * (mi - params['mu_s']) ** 2)
    cheb = jnp.stack([jnp.ones_like(sij), sij, 2 * sij ** 2 - 1], axis=1)

    moments = {0: jnp.ones((ne,)), 1: uij, 2: uij[:, :, None] * uij[:, None, :]}

    x = {}
    for way in range(MAX_IN_WAY + 1):
        nj = node_info[way][idx_j]
        xw = _mm('ei...,io->eo...', nj, params['wu'][way])
        if way == 0:
            xw = xw + params['bu0']
        x[way] = xw

    y = {}
    for way in range(MAX_R_WAY + 1):
        w_r = params['w_rbf'][way][spec[idx_i]]
        rbf_mix = _mm('ec,eco->eo', rbf, w_r)
        sb = _mm('ac,aco->ao', srbf, params['w_spin'][way][spec])
        hehe = rbf_mix * sb[idx_i] * sb[idx_j]
        xixi = (hehe.reshape(ne, N_CHEB, D_OUT) * cheb[:, :, None]).reshape(ne, MIX)
        v = _mm('em,mo->eo', xixi, params['wv'][way])
        y[way] = (v.reshape((ne, D_OUT) + (1,) * way)
                  * moments[way].reshape((ne, 1) + (3,) * way))

    z = {zw: jnp.zeros((ne, D_OUT) + (3,) * zw) for zw in range(MAX_OUT_WAY + 1)}
    for ci, (xw_, yw_, zw_) in enumerate(TP_COMBOS):
        k = (xw_ + yw_ - zw_) // 2
        xf, yf = xw_ - k, yw_ - k
        # contraction over k trailing spatial axes, in f32 (matches in-kernel VPU math)
        xa = x[xw_].reshape(x[xw_].shape[:2] + (3,) * xf + (1,) * yf + (3,) * k)
        ya = y[yw_].reshape(y[yw_].shape[:2] + (1,) * xf + (3,) * yf + (3,) * k)
        c = xa * ya
        if k > 0:
            c = jnp.sum(c, axis=tuple(range(c.ndim - k, c.ndim)))
        c = _mm('eo...,op->ep...', c, params['wtp'][ci])
        z[zw_] = z[zw_] + c
    return z


if __name__ == "__main__":
    key = jax.random.PRNGKey(0)
    k_pos, k_spin, k_spec, k_n0, k_n1, k_n2, k_par = jax.random.split(key, 7)

    n_atoms = 6
    n_edge = 20   # deliberately NOT a multiple of TE: exercises the padding path

    pos = jax.random.normal(k_pos, (n_atoms, 3), jnp.float32) * 1.5
    spin = jax.random.normal(k_spin, (n_atoms, 3), jnp.float32)
    spec = jax.random.randint(k_spec, (n_atoms,), 0, N_ELEM)
    idx_i = jnp.arange(n_edge, dtype=jnp.int32) % n_atoms
    idx_j = (jnp.arange(n_edge, dtype=jnp.int32) + 1) % n_atoms

    node_info = {
        0: jax.random.normal(k_n0, (n_atoms, D_IN), jnp.float32),
        1: jax.random.normal(k_n1, (n_atoms, D_IN, 3), jnp.float32),
        2: jax.random.normal(k_n2, (n_atoms, D_IN, 3, 3), jnp.float32),
    }
    edge_info = {}   # unused by the forward pass
    batch_data = {'idx_i': idx_i, 'idx_j': idx_j, 'coordinate': pos,
                  'spin': spin, 'species': spec}

    params = init_params(k_par)

    out = spin_conv_layer(node_info, edge_info, batch_data, params)
    out = jax.tree_util.tree_map(jax.block_until_ready, out)

    ref = spin_conv_reference(node_info, batch_data, params)
    ref = jax.tree_util.tree_map(jax.block_until_ready, ref)
    for way in range(MAX_OUT_WAY + 1):
        np.testing.assert_allclose(np.asarray(out[way]), np.asarray(ref[way]),
                                   rtol=1e-2, atol=1e-2)

    print("KERNEL_OK")
</pallas_src>

<mosaic_0001>
module attributes {stable_mosaic.version = 11 : i64} {
  func.func @spinconv_kernel(%arg0: i32, %arg1: memref<11x128xf32, #tpu.memory_space<vmem>>, %arg2: memref<104x128xbf16, #tpu.memory_space<vmem>>, %arg3: memref<8x1xf32, #tpu.memory_space<vmem>>, %arg4: memref<8x1xf32, #tpu.memory_space<vmem>>, %arg5: memref<72x16xbf16, #tpu.memory_space<vmem>>, %arg6: memref<72x16xbf16, #tpu.memory_space<vmem>>, %arg7: memref<104x104xbf16, #tpu.memory_space<vmem>>, %arg8: memref<8x1xf32, #tpu.memory_space<vmem>>, %arg9: memref<24x72xbf16, #tpu.memory_space<vmem>>, %arg10: memref<8x24xbf16, #tpu.memory_space<vmem>>, %arg11: memref<24x96xbf16, #tpu.memory_space<vmem>>, %arg12: memref<72x288xbf16, #tpu.memory_space<vmem>>, %arg13: memref<8x128xf32, #tpu.memory_space<vmem>>, %arg14: memref<24x128xf32, #tpu.memory_space<vmem>>, %arg15: memref<72x128xf32, #tpu.memory_space<vmem>>) attributes {dimension_semantics = [#tpu.dimension_semantics<parallel>], iteration_bounds = array<i64: 1>, scalar_prefetch = 0 : i64, scratch_operands = 0 : i64, tpu.core_type = #tpu.core_type<tc>, window_params = [{transform_indices = @transform_0, window_bounds = array<i64: 11, 128>}, {transform_indices = @transform_1, window_bounds = array<i64: 104, 128>}, {pipeline_mode = #tpu.pipeline_mode<synchronous>, transform_indices = @transform_2, window_bounds = array<i64: 8, 1>}, {pipeline_mode = #tpu.pipeline_mode<synchronous>, transform_indices = @transform_3, window_bounds = array<i64: 8, 1>}, {pipeline_mode = #tpu.pipeline_mode<synchronous>, transform_indices = @transform_4, window_bounds = array<i64: 72, 16>}, {pipeline_mode = #tpu.pipeline_mode<synchronous>, transform_indices = @transform_5, window_bounds = array<i64: 72, 16>}, {pipeline_mode = #tpu.pipeline_mode<synchronous>, transform_indices = @transform_6, window_bounds = array<i64: 104, 104>}, {pipeline_mode = #tpu.pipeline_mode<synchronous>, transform_indices = @transform_7, window_bounds = array<i64: 8, 1>}, {pipeline_mode = #tpu.pipeline_mode<synchronous>, transform_indices = @transform_8, window_bounds = array<i64: 24, 72>}, {pipeline_mode = #tpu.pipeline_mode<synchronous>, transform_indices = @transform_9, window_bounds = array<i64: 8, 24>}, {pipeline_mode = #tpu.pipeline_mode<synchronous>, transform_indices = @transform_10, window_bounds = array<i64: 24, 96>}, {pipeline_mode = #tpu.pipeline_mode<synchronous>, transform_indices = @transform_11, window_bounds = array<i64: 72, 288>}, {transform_indices = @transform_12, window_bounds = array<i64: 8, 128>}, {transform_indices = @transform_13, window_bounds = array<i64: 24, 128>}, {transform_indices = @transform_14, window_bounds = array<i64: 72, 128>}]} {
    %c0 = arith.constant 0 : index
    %c0_0 = arith.constant 0 : index
    %0 = vector.load %arg1[%c0, %c0_0] : memref<11x128xf32, #tpu.memory_space<vmem>>, vector<11x128xf32>
    %1 = vector.extract_strided_slice %0 {offsets = [0, 0], sizes = [1, 128], strides = [1, 1]} : vector<11x128xf32> to vector<1x128xf32>
    %2 = vector.extract_strided_slice %0 {offsets = [1, 0], sizes = [1, 128], strides = [1, 1]} : vector<11x128xf32> to vector<1x128xf32>
    %3 = vector.extract_strided_slice %0 {offsets = [2, 0], sizes = [1, 128], strides = [1, 1]} : vector<11x128xf32> to vector<1x128xf32>
    %4 = vector.extract_strided_slice %0 {offsets = [3, 0], sizes = [1, 128], strides = [1, 1]} : vector<11x128xf32> to vector<1x128xf32>
    %5 = vector.extract_strided_slice %0 {offsets = [4, 0], sizes = [2, 128], strides = [1, 1]} : vector<11x128xf32> to vector<2x128xf32>
    %6 = vector.extract_strided_slice %0 {offsets = [6, 0], sizes = [2, 128], strides = [1, 1]} : vector<11x128xf32> to vector<2x128xf32>
    %7 = vector.extract_strided_slice %0 {offsets = [8, 0], sizes = [3, 128], strides = [1, 1]} : vector<11x128xf32> to vector<3x128xf32>
    %c0_1 = arith.constant 0 : index
    %c0_2 = arith.constant 0 : index
    %8 = vector.load %arg3[%c0_1, %c0_2] : memref<8x1xf32, #tpu.memory_space<vmem>>, vector<8x1xf32>
    %9 = vector.broadcast %1 : vector<1x128xf32> to vector<8x128xf32>
    %10 = vector.broadcast %8 : vector<8x1xf32> to vector<8x128xf32>
    %11 = arith.subf %9, %10 : vector<8x128xf32>
    %12 = arith.mulf %11, %11 : vector<8x128xf32>
    %cst = arith.constant -4.000000e+00 : f32
    %13 = vector.broadcast %cst : f32 to vector<8x128xf32>
    %14 = arith.mulf %13, %12 : vector<8x128xf32>
    %15 = math.exp %14 : vector<8x128xf32>
    %c0_3 = arith.constant 0 : index
    %c0_4 = arith.constant 0 : index
    %16 = vector.load %arg4[%c0_3, %c0_4] : memref<8x1xf32, #tpu.memory_space<vmem>>, vector<8x1xf32>
    %17 = vector.broadcast %2 : vector<1x128xf32> to vector<8x128xf32>
    %18 = vector.broadcast %16 : vector<8x1xf32> to vector<8x128xf32>
    %19 = arith.subf %17, %18 : vector<8x128xf32>
    %20 = arith.mulf %19, %19 : vector<8x128xf32>
    %cst_5 = arith.constant -4.000000e+00 : f32
    %21 = vector.broadcast %cst_5 : f32 to vector<8x128xf32>
    %22 = arith.mulf %21, %20 : vector<8x128xf32>
    %23 = math.exp %22 : vector<8x128xf32>
    %c0_6 = arith.constant 0 : index
    %c0_7 = arith.constant 0 : index
    %24 = vector.load %arg4[%c0_6, %c0_7] : memref<8x1xf32, #tpu.memory_space<vmem>>, vector<8x1xf32>
    %25 = vector.broadcast %3 : vector<1x128xf32> to vector<8x128xf32>
    %26 = vector.broadcast %24 : vector<8x1xf32> to vector<8x128xf32>
    %27 = arith.subf %25, %26 : vector<8x128xf32>
    %28 = arith.mulf %27, %27 : vector<8x128xf32>
    %cst_8 = arith.constant -4.000000e+00 : f32
    %29 = vector.broadcast %cst_8 : f32 to vector<8x128xf32>
    %30 = arith.mulf %29, %28 : vector<8x128xf32>
    %31 = math.exp %30 : vector<8x128xf32>
    %c0_9 = arith.constant 0 : index
    %c0_10 = arith.constant 0 : index
    %32 = vector.load %arg5[%c0_9, %c0_10] : memref<72x16xbf16, #tpu.memory_space<vmem>>, vector<72x16xbf16>
    %33 = vector.extract_strided_slice %5 {offsets = [0, 0], sizes = [1, 128], strides = [1, 1]} : vector<2x128xf32> to vector<1x128xf32>
    %34 = vector.broadcast %33 : vector<1x128xf32> to vector<8x128xf32>
    %35 = arith.mulf %15, %34 : vector<8x128xf32>
    %36 = vector.extract_strided_slice %5 {offsets = [1, 0], sizes = [1, 128], strides = [1, 1]} : vector<2x128xf32> to vector<1x128xf32>
    %37 = vector.broadcast %36 : vector<1x128xf32> to vector<8x128xf32>
    %38 = arith.mulf %15, %37 : vector<8x128xf32>
    %39 = tpu.concatenate %35, %38 in 0 : vector<8x128xf32>, vector<8x128xf32> -> vector<16x128xf32>
    %40 = arith.truncf %39 : vector<16x128xf32> to vector<16x128xbf16>
    %cst_11 = arith.constant dense<0.000000e+00> : vector<72x128xf32>
    %41 = tpu.matmul %32, %40, %cst_11 {dimension_numbers = #tpu.dot_dimension_numbers<[1], [0], [0], [1], [0, 0, 1, 1], [], []>} : vector<72x16xbf16>, vector<16x128xbf16>, vector<72x128xf32> -> vector<72x128xf32>
    %c0_12 = arith.constant 0 : index
    %c0_13 = arith.constant 0 : index
    %42 = vector.load %arg6[%c0_12, %c0_13] : memref<72x16xbf16, #tpu.memory_space<vmem>>, vector<72x16xbf16>
    %43 = vector.extract_strided_slice %5 {offsets = [0, 0], sizes = [1, 128], strides = [1, 1]} : vector<2x128xf32> to vector<1x128xf32>
    %44 = vector.broadcast %43 : vector<1x128xf32> to vector<8x128xf32>
    %45 = arith.mulf %23, %44 : vector<8x128xf32>
    %46 = vector.extract_strided_slice %5 {offsets = [1, 0], sizes = [1, 128], strides = [1, 1]} : vector<2x128xf32> to vector<1x128xf32>
    %47 = vector.broadcast %46 : vector<1x128xf32> to vector<8x128xf32>
    %48 = arith.mulf %23, %47 : vector<8x128xf32>
    %49 = tpu.concatenate %45, %48 in 0 : vector<8x128xf32>, vector<8x128xf32> -> vector<16x128xf32>
    %50 = arith.truncf %49 : vector<16x128xf32> to vector<16x128xbf16>
    %cst_14 = arith.constant dense<0.000000e+00> : vector<72x128xf32>
    %51 = tpu.matmul %42, %50, %cst_14 {dimension_numbers = #tpu.dot_dimension_numbers<[1], [0], [0], [1], [0, 0, 1, 1], [], []>} : vector<72x16xbf16>, vector<16x128xbf16>, vector<72x128xf32> -> vector<72x128xf32>
    %c0_15 = arith.constant 0 : index
    %c0_16 = arith.constant 0 : index
    %52 = vector.load %arg6[%c0_15, %c0_16] : memref<72x16xbf16, #tpu.memory_space<vmem>>, vector<72x16xbf16>
    %53 = vector.extract_strided_slice %6 {offsets = [0, 0], sizes = [1, 128], strides = [1, 1]} : vector<2x128xf32> to vector<1x128xf32>
    %54 = vector.broadcast %53 : vector<1x128xf32> to vector<8x128xf32>
    %55 = arith.mulf %31, %54 : vector<8x128xf32>
    %56 = vector.extract_strided_slice %6 {offsets = [1, 0], sizes = [1, 128], strides = [1, 1]} : vector<2x128xf32> to vector<1x128xf32>
    %57 = vector.broadcast %56 : vector<1x128xf32> to vector<8x128xf32>
    %58 = arith.mulf %31, %57 : vector<8x128xf32>
    %59 = tpu.concatenate %55, %58 in 0 : vector<8x128xf32>, vector<8x128xf32> -> vector<16x128xf32>
    %60 = arith.truncf %59 : vector<16x128xf32> to vector<16x128xbf16>
    %cst_17 = arith.constant dense<0.000000e+00> : vector<72x128xf32>
    %61 = tpu.matmul %52, %60, %cst_17 {dimension_numbers = #tpu.dot_dimension_numbers<[1], [0], [0], [1], [0, 0, 1, 1], [], []>} : vector<72x16xbf16>, vector<16x128xbf16>, vector<72x128xf32> -> vector<72x128xf32>
    %62 = arith.mulf %41, %51 : vector<72x128xf32>
    %63 = arith.mulf %62, %61 : vector<72x128xf32>
    %cst_18 = arith.constant 2.000000e+00 : f32
    %64 = vector.broadcast %cst_18 : f32 to vector<1x128xf32>
    %65 = arith.mulf %64, %4 : vector<1x128xf32>
    %66 = arith.mulf %65, %4 : vector<1x128xf32>
    %cst_19 = arith.constant 1.000000e+00 : f32
    %67 = vector.broadcast %cst_19 : f32 to vector<1x128xf32>
    %68 = arith.subf %66, %67 : vector<1x128xf32>
    %cst_20 = arith.constant 1.000000e+00 : f32
    %69 = vector.broadcast %cst_20 : f32 to vector<8x128xf32>
    %70 = vector.shape_cast %4 : vector<1x128xf32> to vector<1x128xf32>
    %71 = vector.broadcast %70 : vector<1x128xf32> to vector<8x128xf32>
    %72 = vector.shape_cast %68 : vector<1x128xf32> to vector<1x128xf32>
    %73 = vector.broadcast %72 : vector<1x128xf32> to vector<8x128xf32>
    %74 = tpu.concatenate %69, %71, %73 in 0 : vector<8x128xf32>, vector<8x128xf32>, vector<8x128xf32> -> vector<24x128xf32>
    %75 = tpu.concatenate %74, %74, %74 in 0 : vector<24x128xf32>, vector<24x128xf32>, vector<24x128xf32> -> vector<72x128xf32>
    %76 = arith.mulf %63, %75 : vector<72x128xf32>
    %c0_21 = arith.constant 0 : index
    %c0_22 = arith.constant 0 : index
    %77 = vector.load %arg9[%c0_21, %c0_22] : memref<24x72xbf16, #tpu.memory_space<vmem>>, vector<24x72xbf16>
    %78 = arith.truncf %76 : vector<72x128xf32> to vector<72x128xbf16>
    %cst_23 = arith.constant dense<0.000000e+00> : vector<24x128xf32>
    %79 = tpu.matmul %77, %78, %cst_23 {dimension_numbers = #tpu.dot_dimension_numbers<[1], [0], [0], [1], [0, 0, 1, 1], [], []>} : vector<24x72xbf16>, vector<72x128xbf16>, vector<24x128xf32> -> vector<24x128xf32>
    %c0_24 = arith.constant 0 : index
    %c0_25 = arith.constant 0 : index
    %80 = vector.load %arg7[%c0_24, %c0_25] : memref<104x104xbf16, #tpu.memory_space<vmem>>, vector<104x104xbf16>
    %c0_26 = arith.constant 0 : index
    %c0_27 = arith.constant 0 : index
    %81 = vector.load %arg2[%c0_26, %c0_27] : memref<104x128xbf16, #tpu.memory_space<vmem>>, vector<104x128xbf16>
    %cst_28 = arith.constant dense<0.000000e+00> : vector<104x128xf32>
    %82 = tpu.matmul %80, %81, %cst_28 {dimension_numbers = #tpu.dot_dimension_numbers<[1], [0], [0], [1], [0, 0, 1, 1], [], []>} : vector<104x104xbf16>, vector<104x128xbf16>, vector<104x128xf32> -> vector<104x128xf32>
    %83 = vector.extract_strided_slice %82 {offsets = [0, 0], sizes = [8, 128], strides = [1, 1]} : vector<104x128xf32> to vector<8x128xf32>
    %c0_29 = arith.constant 0 : index
    %c0_30 = arith.constant 0 : index
    %84 = vector.load %arg8[%c0_29, %c0_30] : memref<8x1xf32, #tpu.memory_space<vmem>>, vector<8x1xf32>
    %85 = vector.broadcast %84 : vector<8x1xf32> to vector<8x128xf32>
    %86 = arith.addf %83, %85 : vector<8x128xf32>
    %87 = vector.extract_strided_slice %82 {offsets = [8, 0], sizes = [8, 128], strides = [1, 1]} : vector<104x128xf32> to vector<8x128xf32>
    %88 = vector.extract_strided_slice %82 {offsets = [16, 0], sizes = [8, 128], strides = [1, 1]} : vector<104x128xf32> to vector<8x128xf32>
    %89 = vector.extract_strided_slice %82 {offsets = [24, 0], sizes = [8, 128], strides = [1, 1]} : vector<104x128xf32> to vector<8x128xf32>
    %90 = vector.extract_strided_slice %82 {offsets = [32, 0], sizes = [8, 128], strides = [1, 1]} : vector<104x128xf32> to vector<8x128xf32>
    %91 = vector.extract_strided_slice %82 {offsets = [40, 0], sizes = [8, 128], strides = [1, 1]} : vector<104x128xf32> to vector<8x128xf32>
    %92 = vector.extract_strided_slice %82 {offsets = [48, 0], sizes = [8, 128], strides = [1, 1]} : vector<104x128xf32> to vector<8x128xf32>
    %93 = vector.extract_strided_slice %82 {offsets = [56, 0], sizes = [8, 128], strides = [1, 1]} : vector<104x128xf32> to vector<8x128xf32>
    %94 = vector.extract_strided_slice %82 {offsets = [64, 0], sizes = [8, 128], strides = [1, 1]} : vector<104x128xf32> to vector<8x128xf32>
    %95 = vector.extract_strided_slice %82 {offsets = [72, 0], sizes = [8, 128], strides = [1, 1]} : vector<104x128xf32> to vector<8x128xf32>
    %96 = vector.extract_strided_slice %82 {offsets = [80, 0], sizes = [8, 128], strides = [1, 1]} : vector<104x128xf32> to vector<8x128xf32>
    %97 = vector.extract_strided_slice %82 {offsets = [88, 0], sizes = [8, 128], strides = [1, 1]} : vector<104x128xf32> to vector<8x128xf32>
    %98 = vector.extract_strided_slice %82 {offsets = [96, 0], sizes = [8, 128], strides = [1, 1]} : vector<104x128xf32> to vector<8x128xf32>
    %99 = vector.extract_strided_slice %79 {offsets = [0, 0], sizes = [8, 128], strides = [1, 1]} : vector<24x128xf32> to vector<8x128xf32>
    %100 = vector.extract_strided_slice %79 {offsets = [8, 0], sizes = [8, 128], strides = [1, 1]} : vector<24x128xf32> to vector<8x128xf32>
    %101 = vector.extract_strided_slice %7 {offsets = [0, 0], sizes = [1, 128], strides = [1, 1]} : vector<3x128xf32> to vector<1x128xf32>
    %102 = vector.broadcast %101 : vector<1x128xf32> to vector<8x128xf32>
    %103 = arith.mulf %100, %102 : vector<8x128xf32>
    %104 = vector.extract_strided_slice %7 {offsets = [1, 0], sizes = [1, 128], strides = [1, 1]} : vector<3x128xf32> to vector<1x128xf32>
    %105 = vector.broadcast %104 : vector<1x128xf32> to vector<8x128xf32>
    %106 = arith.mulf %100, %105 : vector<8x128xf32>
    %107 = vector.extract_strided_slice %7 {offsets = [2, 0], sizes = [1, 128], strides = [1, 1]} : vector<3x128xf32> to vector<1x128xf32>
    %108 = vector.broadcast %107 : vector<1x128xf32> to vector<8x128xf32>
    %109 = arith.mulf %100, %108 : vector<8x128xf32>
    %110 = vector.extract_strided_slice %79 {offsets = [16, 0], sizes = [8, 128], strides = [1, 1]} : vector<24x128xf32> to vector<8x128xf32>
    %111 = vector.extract_strided_slice %7 {offsets = [0, 0], sizes = [1, 128], strides = [1, 1]} : vector<3x128xf32> to vector<1x128xf32>
    %112 = vector.extract_strided_slice %7 {offsets = [0, 0], sizes = [1, 128], strides = [1, 1]} : vector<3x128xf32> to vector<1x128xf32>
    %113 = arith.mulf %111, %112 : vector<1x128xf32>
    %114 = vector.broadcast %113 : vector<1x128xf32> to vector<8x128xf32>
    %115 = arith.mulf %110, %114 : vector<8x128xf32>
    %116 = vector.extract_strided_slice %7 {offsets = [0, 0], sizes = [1, 128], strides = [1, 1]} : vector<3x128xf32> to vector<1x128xf32>
    %117 = vector.extract_strided_slice %7 {offsets = [1, 0], sizes = [1, 128], strides = [1, 1]} : vector<3x128xf32> to vector<1x128xf32>
    %118 = arith.mulf %116, %117 : vector<1x128xf32>
    %119 = vector.broadcast %118 : vector<1x128xf32> to vector<8x128xf32>
    %120 = arith.mulf %110, %119 : vector<8x128xf32>
    %121 = vector.extract_strided_slice %7 {offsets = [0, 0], sizes = [1, 128], strides = [1, 1]} : vector<3x128xf32> to vector<1x128xf32>
    %122 = vector.extract_strided_slice %7 {offsets = [2, 0], sizes = [1, 128], strides = [1, 1]} : vector<3x128xf32> to vector<1x128xf32>
    %123 = arith.mulf %121, %122 : vector<1x128xf32>
    %124 = vector.broadcast %123 : vector<1x128xf32> to vector<8x128xf32>
    %125 = arith.mulf %110, %124 : vector<8x128xf32>
    %126 = vector.extract_strided_slice %7 {offsets = [1, 0], sizes = [1, 128], strides = [1, 1]} : vector<3x128xf32> to vector<1x128xf32>
    %127 = vector.extract_strided_slice %7 {offsets = [0, 0], sizes = [1, 128], strides = [1, 1]} : vector<3x128xf32> to vector<1x128xf32>
    %128 = arith.mulf %126, %127 : vector<1x128xf32>
    %129 = vector.broadcast %128 : vector<1x128xf32> to vector<8x128xf32>
    %130 = arith.mulf %110, %129 : vector<8x128xf32>
    %131 = vector.extract_strided_slice %7 {offsets = [1, 0], sizes = [1, 128], strides = [1, 1]} : vector<3x128xf32> to vector<1x128xf32>
    %132 = vector.extract_strided_slice %7 {offsets = [1, 0], sizes = [1, 128], strides = [1, 1]} : vector<3x128xf32> to vector<1x128xf32>
    %133 = arith.mulf %131, %132 : vector<1x128xf32>
    %134 = vector.broadcast %133 : vector<1x128xf32> to vector<8x128xf32>
    %135 = arith.mulf %110, %134 : vector<8x128xf32>
    %136 = vector.extract_strided_slice %7 {offsets = [1, 0], sizes = [1, 128], strides = [1, 1]} : vector<3x128xf32> to vector<1x128xf32>
    %137 = vector.extract_strided_slice %7 {offsets = [2, 0], sizes = [1, 128], strides = [1, 1]} : vector<3x128xf32> to vector<1x128xf32>
    %138 = arith.mulf %136, %137 : vector<1x128xf32>
    %139 = vector.broadcast %138 : vector<1x128xf32> to vector<8x128xf32>
    %140 = arith.mulf %110, %139 : vector<8x128xf32>
    %141 = vector.extract_strided_slice %7 {offsets = [2, 0], sizes = [1, 128], strides = [1, 1]} : vector<3x128xf32> to vector<1x128xf32>
    %142 = vector.extract_strided_slice %7 {offsets = [0, 0], sizes = [1, 128], strides = [1, 1]} : vector<3x128xf32> to vector<1x128xf32>
    %143 = arith.mulf %141, %142 : vector<1x128xf32>
    %144 = vector.broadcast %143 : vector<1x128xf32> to vector<8x128xf32>
    %145 = arith.mulf %110, %144 : vector<8x128xf32>
    %146 = vector.extract_strided_slice %7 {offsets = [2, 0], sizes = [1, 128], strides = [1, 1]} : vector<3x128xf32> to vector<1x128xf32>
    %147 = vector.extract_strided_slice %7 {offsets = [1, 0], sizes = [1, 128], strides = [1, 1]} : vector<3x128xf32> to vector<1x128xf32>
    %148 = arith.mulf %146, %147 : vector<1x128xf32>
    %149 = vector.broadcast %148 : vector<1x128xf32> to vector<8x128xf32>
    %150 = arith.mulf %110, %149 : vector<8x128xf32>
    %151 = vector.extract_strided_slice %7 {offsets = [2, 0], sizes = [1, 128], strides = [1, 1]} : vector<3x128xf32> to vector<1x128xf32>
    %152 = vector.extract_strided_slice %7 {offsets = [2, 0], sizes = [1, 128], strides = [1, 1]} : vector<3x128xf32> to vector<1x128xf32>
    %153 = arith.mulf %151, %152 : vector<1x128xf32>
    %154 = vector.broadcast %153 : vector<1x128xf32> to vector<8x128xf32>
    %155 = arith.mulf %110, %154 : vector<8x128xf32>
    %156 = arith.mulf %86, %99 : vector<8x128xf32>
    %157 = arith.mulf %87, %103 : vector<8x128xf32>
    %158 = arith.mulf %88, %106 : vector<8x128xf32>
    %159 = arith.addf %157, %158 : vector<8x128xf32>
    %160 = arith.mulf %89, %109 : vector<8x128xf32>
    %161 = arith.addf %159, %160 : vector<8x128xf32>
    %162 = arith.mulf %90, %115 : vector<8x128xf32>
    %163 = arith.mulf %91, %120 : vector<8x128xf32>
    %164 = arith.addf %162, %163 : vector<8x128xf32>
    %165 = arith.mulf %92, %125 : vector<8x128xf32>
    %166 = arith.addf %164, %165 : vector<8x128xf32>
    %167 = arith.mulf %93, %130 : vector<8x128xf32>
    %168 = arith.addf %166, %167 : vector<8x128xf32>
    %169 = arith.mulf %94, %135 : vector<8x128xf32>
    %170 = arith.addf %168, %169 : vector<8x128xf32>
    %171 = arith.mulf %95, %140 : vector<8x128xf32>
    %172 = arith.addf %170, %171 : vector<8x128xf32>
    %173 = arith.mulf %96, %145 : vector<8x128xf32>
    %174 = arith.addf %172, %173 : vector<8x128xf32>
    %175 = arith.mulf %97, %150 : vector<8x128xf32>
    %176 = arith.addf %174, %175 : vector<8x128xf32>
    %177 = arith.mulf %98, %155 : vector<8x128xf32>
    %178 = arith.addf %176, %177 : vector<8x128xf32>
    %179 = tpu.concatenate %156, %161, %178 in 0 : vector<8x128xf32>, vector<8x128xf32>, vector<8x128xf32> -> vector<24x128xf32>
    %c0_31 = arith.constant 0 : index
    %c0_32 = arith.constant 0 : index
    %180 = vector.load %arg10[%c0_31, %c0_32] : memref<8x24xbf16, #tpu.memory_space<vmem>>, vector<8x24xbf16>
    %181 = arith.truncf %179 : vector<24x128xf32> to vector<24x128xbf16>
    %cst_33 = arith.constant dense<0.000000e+00> : vector<8x128xf32>
    %182 = tpu.matmul %180, %181, %cst_33 {dimension_numbers = #tpu.dot_dimension_numbers<[1], [0], [0], [1], [0, 0, 1, 1], [], []>} : vector<8x24xbf16>, vector<24x128xbf16>, vector<8x128xf32> -> vector<8x128xf32>
    %c0_34 = arith.constant 0 : index
    %c0_35 = arith.constant 0 : index
    %183 = vector.load %arg13[%c0_34, %c0_35] : memref<8x128xf32, #tpu.memory_space<vmem>>, vector<8x128xf32>
    tpu.vector_store %arg13[%c0_34, %c0_35], %182 {strides = array<i32>} : memref<8x128xf32, #tpu.memory_space<vmem>>, vector<8x128xf32>,
    %184 = arith.mulf %86, %103 : vector<8x128xf32>
    %185 = arith.mulf %87, %99 : vector<8x128xf32>
    %186 = arith.mulf %87, %115 : vector<8x128xf32>
    %187 = arith.mulf %88, %120 : vector<8x128xf32>
    %188 = arith.addf %186, %187 : vector<8x128xf32>
    %189 = arith.mulf %89, %125 : vector<8x128xf32>
    %190 = arith.addf %188, %189 : vector<8x128xf32>
    %191 = arith.mulf %90, %103 : vector<8x128xf32>
    %192 = arith.mulf %91, %106 : vector<8x128xf32>
    %193 = arith.addf %191, %192 : vector<8x128xf32>
    %194 = arith.mulf %92, %109 : vector<8x128xf32>
    %195 = arith.addf %193, %194 : vector<8x128xf32>
    %196 = arith.mulf %86, %106 : vector<8x128xf32>
    %197 = arith.mulf %88, %99 : vector<8x128xf32>
    %198 = arith.mulf %87, %130 : vector<8x128xf32>
    %199 = arith.mulf %88, %135 : vector<8x128xf32>
    %200 = arith.addf %198, %199 : vector<8x128xf32>
    %201 = arith.mulf %89, %140 : vector<8x128xf32>
    %202 = arith.addf %200, %201 : vector<8x128xf32>
    %203 = arith.mulf %93, %103 : vector<8x128xf32>
    %204 = arith.mulf %94, %106 : vector<8x128xf32>
    %205 = arith.addf %203, %204 : vector<8x128xf32>
    %206 = arith.mulf %95, %109 : vector<8x128xf32>
    %207 = arith.addf %205, %206 : vector<8x128xf32>
    %208 = arith.mulf %86, %109 : vector<8x128xf32>
    %209 = arith.mulf %89, %99 : vector<8x128xf32>
    %210 = arith.mulf %87, %145 : vector<8x128xf32>
    %211 = arith.mulf %88, %150 : vector<8x128xf32>
    %212 = arith.addf %210, %211 : vector<8x128xf32>
    %213 = arith.mulf %89, %155 : vector<8x128xf32>
    %214 = arith.addf %212, %213 : vector<8x128xf32>
    %215 = arith.mulf %96, %103 : vector<8x128xf32>
    %216 = arith.mulf %97, %106 : vector<8x128xf32>
    %217 = arith.addf %215, %216 : vector<8x128xf32>
    %218 = arith.mulf %98, %109 : vector<8x128xf32>
    %219 = arith.addf %217, %218 : vector<8x128xf32>
    %220 = tpu.concatenate %184, %185, %190, %195, %196, %197, %202, %207, %208, %209, %214, %219 in 0 : vector<8x128xf32>, vector<8x128xf32>, vector<8x128xf32>, vector<8x128xf32>, vector<8x128xf32>, vector<8x128xf32>, vector<8x128xf32>, vector<8x128xf32>, vector<8x128xf32>, vector<8x128xf32>, vector<8x128xf32>, vector<8x128xf32> -> vector<96x128xf32>
    %c0_36 = arith.constant 0 : index
    %c0_37 = arith.constant 0 : index
    %221 = vector.load %arg11[%c0_36, %c0_37] : memref<24x96xbf16, #tpu.memory_space<vmem>>, vector<24x96xbf16>
    %222 = arith.truncf %220 : vector<96x128xf32> to vector<96x128xbf16>
    %cst_38 = arith.constant dense<0.000000e+00> : vector<24x128xf32>
    %223 = tpu.matmul %221, %222, %cst_38 {dimension_numbers = #tpu.dot_dimension_numbers<[1], [0], [0], [1], [0, 0, 1, 1], [], []>} : vector<24x96xbf16>, vector<96x128xbf16>, vector<24x128xf32> -> vector<24x128xf32>
    %c0_39 = arith.constant 0 : index
    %c0_40 = arith.constant 0 : index
    %224 = vector.load %arg14[%c0_39, %c0_40] : memref<24x128xf32, #tpu.memory_space<vmem>>, vector<24x128xf32>
    tpu.vector_store %arg14[%c0_39, %c0_40], %223 {strides = array<i32>} : memref<24x128xf32, #tpu.memory_space<vmem>>, vector<24x128xf32>,
    %225 = arith.mulf %86, %115 : vector<8x128xf32>
    %226 = arith.mulf %90, %99 : vector<8x128xf32>
    %227 = arith.mulf %87, %103 : vector<8x128xf32>
    %228 = arith.mulf %90, %115 : vector<8x128xf32>
    %229 = arith.mulf %91, %120 : vector<8x128xf32>
    %230 = arith.addf %228, %229 : vector<8x128xf32>
    %231 = arith.mulf %92, %125 : vector<8x128xf32>
    %232 = arith.addf %230, %231 : vector<8x128xf32>
    %233 = arith.mulf %86, %120 : vector<8x128xf32>
    %234 = arith.mulf %91, %99 : vector<8x128xf32>
    %235 = arith.mulf %87, %106 : vector<8x128xf32>
    %236 = arith.mulf %90, %130 : vector<8x128xf32>
    %237 = arith.mulf %91, %135 : vector<8x128xf32>
    %238 = arith.addf %236, %237 : vector<8x128xf32>
    %239 = arith.mulf %92, %140 : vector<8x128xf32>
    %240 = arith.addf %238, %239 : vector<8x128xf32>
    %241 = arith.mulf %86, %125 : vector<8x128xf32>
    %242 = arith.mulf %92, %99 : vector<8x128xf32>
    %243 = arith.mulf %87, %109 : vector<8x128xf32>
    %244 = arith.mulf %90, %145 : vector<8x128xf32>
    %245 = arith.mulf %91, %150 : vector<8x128xf32>
    %246 = arith.addf %244, %245 : vector<8x128xf32>
    %247 = arith.mulf %92, %155 : vector<8x128xf32>
    %248 = arith.addf %246, %247 : vector<8x128xf32>
    %249 = arith.mulf %86, %130 : vector<8x128xf32>
    %250 = arith.mulf %93, %99 : vector<8x128xf32>
    %251 = arith.mulf %88, %103 : vector<8x128xf32>
    %252 = arith.mulf %93, %115 : vector<8x128xf32>
    %253 = arith.mulf %94, %120 : vector<8x128xf32>
    %254 = arith.addf %252, %253 : vector<8x128xf32>
    %255 = arith.mulf %95, %125 : vector<8x128xf32>
    %256 = arith.addf %254, %255 : vector<8x128xf32>
    %257 = arith.mulf %86, %135 : vector<8x128xf32>
    %258 = arith.mulf %94, %99 : vector<8x128xf32>
    %259 = arith.mulf %88, %106 : vector<8x128xf32>
    %260 = arith.mulf %93, %130 : vector<8x128xf32>
    %261 = arith.mulf %94, %135 : vector<8x128xf32>
    %262 = arith.addf %260, %261 : vector<8x128xf32>
    %263 = arith.mulf %95, %140 : vector<8x128xf32>
    %264 = arith.addf %262, %263 : vector<8x128xf32>
    %265 = arith.mulf %86, %140 : vector<8x128xf32>
    %266 = arith.mulf %95, %99 : vector<8x128xf32>
    %267 = arith.mulf %88, %109 : vector<8x128xf32>
    %268 = arith.mulf %93, %145 : vector<8x128xf32>
    %269 = arith.mulf %94, %150 : vector<8x128xf32>
    %270 = arith.addf %268, %269 : vector<8x128xf32>
    %271 = arith.mulf %95, %155 : vector<8x128xf32>
    %272 = arith.addf %270, %271 : vector<8x128xf32>
    %273 = arith.mulf %86, %145 : vector<8x128xf32>
    %274 = arith.mulf %96, %99 : vector<8x128xf32>
    %275 = arith.mulf %89, %103 : vector<8x128xf32>
    %276 = arith.mulf %96, %115 : vector<8x128xf32>
    %277 = arith.mulf %97, %120 : vector<8x128xf32>
    %278 = arith.addf %276, %277 : vector<8x128xf32>
    %279 = arith.mulf %98, %125 : vector<8x128xf32>
    %280 = arith.addf %278, %279 : vector<8x128xf32>
    %281 = arith.mulf %86, %150 : vector<8x128xf32>
    %282 = arith.mulf %97, %99 : vector<8x128xf32>
    %283 = arith.mulf %89, %106 : vector<8x128xf32>
    %284 = arith.mulf %96, %130 : vector<8x128xf32>
    %285 = arith.mulf %97, %135 : vector<8x128xf32>
    %286 = arith.addf %284, %285 : vector<8x128xf32>
    %287 = arith.mulf %98, %140 : vector<8x128xf32>
    %288 = arith.addf %286, %287 : vector<8x128xf32>
    %289 = arith.mulf %86, %155 : vector<8x128xf32>
    %290 = arith.mulf %98, %99 : vector<8x128xf32>
    %291 = arith.mulf %89, %109 : vector<8x128xf32>
    %292 = arith.mulf %96, %145 : vector<8x128xf32>
    %293 = arith.mulf %97, %150 : vector<8x128xf32>
    %294 = arith.addf %292, %293 : vector<8x128xf32>
    %295 = arith.mulf %98, %155 : vector<8x128xf32>
    %296 = arith.addf %294, %295 : vector<8x128xf32>
    %297 = tpu.concatenate %225, %226, %227, %232, %233, %234, %235, %240, %241, %242, %243, %248, %249, %250, %251, %256 in 0 : vector<8x128xf32>, vector<8x128xf32>, vector<8x128xf32>, vector<8x128xf32>, vector<8x128xf32>, vector<8x128xf32>, vector<8x128xf32>, vector<8x128xf32>, vector<8x128xf32>, vector<8x128xf32>, vector<8x128xf32>, vector<8x128xf32>, vector<8x128xf32>, vector<8x128xf32>, vector<8x128xf32>, vector<8x128xf32> -> vector<128x128xf32>
    %298 = tpu.concatenate %257, %258, %259, %264, %265, %266, %267, %272, %273, %274, %275, %280, %281, %282, %283, %288 in 0 : vector<8x128xf32>, vector<8x128xf32>, vector<8x128xf32>, vector<8x128xf32>, vector<8x128xf32>, vector<8x128xf32>, vector<8x128xf32>, vector<8x128xf32>, vector<8x128xf32>, vector<8x128xf32>, vector<8x128xf32>, vector<8x128xf32>, vector<8x128xf32>, vector<8x128xf32>, vector<8x128xf32>, vector<8x128xf32> -> vector<128x128xf32>
    %299 = tpu.concatenate %289, %290, %291, %296 in 0 : vector<8x128xf32>, vector<8x128xf32>, vector<8x128xf32>, vector<8x128xf32> -> vector<32x128xf32>
    %300 = tpu.concatenate %297, %298, %299 in 0 : vector<128x128xf32>, vector<128x128xf32>, vector<32x128xf32> -> vector<288x128xf32>
    %c0_41 = arith.constant 0 : index
    %c0_42 = arith.constant 0 : index
    %301 = vector.load %arg12[%c0_41, %c0_42] : memref<72x288xbf16, #tpu.memory_space<vmem>>, vector<72x288xbf16>
    %302 = arith.truncf %300 : vector<288x128xf32> to vector<288x128xbf16>
    %cst_43 = arith.constant dense<0.000000e+00> : vector<72x128xf32>
    %303 = tpu.matmul %301, %302, %cst_43 {dimension_numbers = #tpu.dot_dimension_numbers<[1], [0], [0], [1], [0, 0, 1, 1], [], []>} : vector<72x288xbf16>, vector<288x128xbf16>, vector<72x128xf32> -> vector<72x128xf32>
    %c0_44 = arith.constant 0 : index
    %c0_45 = arith.constant 0 : index
    %304 = vector.load %arg15[%c0_44, %c0_45] : memref<72x128xf32, #tpu.memory_space<vmem>>, vector<72x128xf32>
    tpu.vector_store %arg15[%c0_44, %c0_45], %303 {strides = array<i32>} : memref<72x128xf32, #tpu.memory_space<vmem>>, vector<72x128xf32>,
    return
  }
  func.func @transform_0(%arg0: i32) -> (i32, i32) {
    %c0_i32 = arith.constant 0 : i32
    %c0_i32_0 = arith.constant 0 : i32
    return %c0_i32, %arg0 : i32, i32
  }
  func.func @transform_1(%arg0: i32) -> (i32, i32) {
    %c0_i32 = arith.constant 0 : i32
    %c0_i32_0 = arith.constant 0 : i32
    return %c0_i32, %arg0 : i32, i32
  }
  func.func @transform_2(%arg0: i32) -> (i32, i32) {
    %c0_i32 = arith.constant 0 : i32
    %c0_i32_0 = arith.constant 0 : i32
    %c0_i32_1 = arith.constant 0 : i32
    return %c0_i32, %c0_i32_0 : i32, i32
  }
  func.func @transform_3(%arg0: i32) -> (i32, i32) {
    %c0_i32 = arith.constant 0 : i32
    %c0_i32_0 = arith.constant 0 : i32
    %c0_i32_1 = arith.constant 0 : i32
    return %c0_i32, %c0_i32_0 : i32, i32
  }
  func.func @transform_4(%arg0: i32) -> (i32, i32) {
    %c0_i32 = arith.constant 0 : i32
    %c0_i32_0 = arith.constant 0 : i32
    %c0_i32_1 = arith.constant 0 : i32
    return %c0_i32, %c0_i32_0 : i32, i32
  }
  func.func @transform_5(%arg0: i32) -> (i32, i32) {
    %c0_i32 = arith.constant 0 : i32
    %c0_i32_0 = arith.constant 0 : i32
    %c0_i32_1 = arith.constant 0 : i32
    return %c0_i32, %c0_i32_0 : i32, i32
  }
  func.func @transform_6(%arg0: i32) -> (i32, i32) {
    %c0_i32 = arith.constant 0 : i32
    %c0_i32_0 = arith.constant 0 : i32
    %c0_i32_1 = arith.constant 0 : i32
    return %c0_i32, %c0_i32_0 : i32, i32
  }
  func.func @transform_7(%arg0: i32) -> (i32, i32) {
    %c0_i32 = arith.constant 0 : i32
    %c0_i32_0 = arith.constant 0 : i32
    %c0_i32_1 = arith.constant 0 : i32
    return %c0_i32, %c0_i32_0 : i32, i32
  }
  func.func @transform_8(%arg0: i32) -> (i32, i32) {
    %c0_i32 = arith.constant 0 : i32
    %c0_i32_0 = arith.constant 0 : i32
    %c0_i32_1 = arith.constant 0 : i32
    return %c0_i32, %c0_i32_0 : i32, i32
  }
  func.func @transform_9(%arg0: i32) -> (i32, i32) {
    %c0_i32 = arith.constant 0 : i32
    %c0_i32_0 = arith.constant 0 : i32
    %c0_i32_1 = arith.constant 0 : i32
    return %c0_i32, %c0_i32_0 : i32, i32
  }
  func.func @transform_10(%arg0: i32) -> (i32, i32) {
    %c0_i32 = arith.constant 0 : i32
    %c0_i32_0 = arith.constant 0 : i32
    %c0_i32_1 = arith.constant 0 : i32
    return %c0_i32, %c0_i32_0 : i32, i32
  }
  func.func @transform_11(%arg0: i32) -> (i32, i32) {
    %c0_i32 = arith.constant 0 : i32
    %c0_i32_0 = arith.constant 0 : i32
    %c0_i32_1 = arith.constant 0 : i32
    return %c0_i32, %c0_i32_0 : i32, i32
  }
  func.func @transform_12(%arg0: i32) -> (i32, i32) {
    %c0_i32 = arith.constant 0 : i32
    %c0_i32_0 = arith.constant 0 : i32
    return %c0_i32, %arg0 : i32, i32
  }
  func.func @transform_13(%arg0: i32) -> (i32, i32) {
    %c0_i32 = arith.constant 0 : i32
    %c0_i32_0 = arith.constant 0 : i32
    return %c0_i32, %arg0 : i32, i32
  }
  func.func @transform_14(%arg0: i32) -> (i32, i32) {
    %c0_i32 = arith.constant 0 : i32
    %c0_i32_0 = arith.constant 0 : i32
    return %c0_i32, %arg0 : i32, i32
  }
}

</mosaic_0001>

<bundles_post_ra>
// kernel: tpu_custom_call.1
= control target key start
LH: loop header
LB: loop body
LE: loop exit
PB: predicated region body
PF: predicated region fallthrough
CT: control target
= control target key end

     0   :  { %20 = vsyncpa [#allocation3], 0  ;;  %s2604_s0 = inlined_call_operand.vmem [shape: f32[11,128], index: 0, kind: input, shape index: {}]   ;;  %s2605_s1 = inlined_call_operand.hbm [shape: bf16[104,128], index: 1, kind: input, shape index: {}]   ;;  %s2606_s2 = inlined_call_operand.vmem [shape: f32[8,1], index: 2, kind: input, shape index: {}]   ;;  %s2607_s3 = inlined_call_operand.vmem [shape: f32[8,1], index: 3, kind: input, shape index: {}]   ;;  %s2608_s4 = inlined_call_operand.vmem [shape: bf16[72,16], index: 4, kind: input, shape index: {}]   ;;  %s2609_s5 = inlined_call_operand.vmem [shape: bf16[72,16], index: 5, kind: input, shape index: {}]   ;;  %s2610_s6 = inlined_call_operand.hbm [shape: bf16[104,104], index: 6, kind: input, shape index: {}]   ;;  %s2611_s7 = inlined_call_operand.vmem [shape: f32[8,1], index: 7, kind: input, shape index: {}]   ;;  %s2612_s8 = inlined_call_operand.hbm [shape: bf16[24,72], index: 8, kind: input, shape index: {}]   ;;  %s2613_s9 = inlined_call_operand.vmem [shape: bf16[8,24], index: 9, kind: input, shape index: {}]   ;;  %s2614_s10 = inlined_call_operand.hbm [shape: bf16[24,96], index: 10, kind: input, shape index: {}]   ;;  %s2615_s11 = inlined_call_operand.vmem [shape: bf16[72,288], index: 11, kind: input, shape index: {}]   ;;  %s2616_s12 = inlined_call_operand.hbm [shape: f32[8,128], index: 12, kind: output, shape index: {0}]   ;;  %s2617_s13 = inlined_call_operand.hbm [shape: f32[24,128], index: 13, kind: output, shape index: {1}]   ;;  %s2618_s14 = inlined_call_operand.hbm [shape: f32[72,128], index: 14, kind: output, shape index: {2}]  }
   0x1   :  { %21 = vsyncpa [#allocation6], 0 }
   0x2   :  { %22 = vsyncpa [#allocation9], 0 }
   0x3   :  { %23 = vsyncpa [#allocation4], 0 }
   0x4   :  { %24 = vsyncpa [#allocation12], 0  ;;  %s1994_s29 = smov [#allocation5]   ;;  %s1995_s15 = smov [#allocation2]  }
   0x5   :  { %s52_s30 = sshll.u32 %s1994_s29, 4  ;;  %s32_s16 = sshll.u32 %s1995_s15, 4  ;;  %s53_s30 = int_to_ptr.vmem [resolvable:$true] %s52_s30  ;;  %s33_s16 = int_to_ptr.vmem [resolvable:$true] %s32_s16 }
   0x6   :  { %s1852_s17 = scalar_lea.vmem %s53_s30, 832  ;;  %p1857_p1 = scmp.lt.s32.totalorder %s53_s30, %s53_s30 }
   0x7   :  { %p1853_p0 = scmp.ne.s32.totalorder %s53_s30, %s1852_s17  ;;  %p1858_p2 = scmp.lt.s32.totalorder %s1852_s17, %s1852_s17 }
   0x9   :  { %p1859_p3 = por %p1858_p2, %p1857_p1 }
   0xb   :  { %p1860_p4 = pnand %p1859_p3, %p1853_p0 }
   0xd   :  { %1863 = shalt.err (!%p1860_p4)
}
   0xe   :  { %s1996_s18 = smov 64   ;;  %s1997_s19 = smov 4  }
   0xf   :  { %58 = dma.hbm_to_vmem [thread:$0]  %s2610_s6, 832, %s53_s30, [#allocation6], %s1996_s18, %s1996_s18, %s1997_s19  }
  0x10   :  { %s1872_s22 = scalar_lea.vmem %s33_s16, 832  ;;  %p1877_p6 = scmp.lt.s32.totalorder %s33_s16, %s33_s16 }
  0x11   :  { %p1873_p5 = scmp.ne.s32.totalorder %s33_s16, %s1872_s22  ;;  %p1878_p7 = scmp.lt.s32.totalorder %s1872_s22, %s1872_s22 }
  0x13   :  { %p1879_p8 = por %p1878_p7, %p1877_p6 }
  0x15   :  { %p1880_p9 = pnand %p1879_p8, %p1873_p5 }
  0x17   :  { %1883 = shalt.err (!%p1880_p9)
}
  0x18   :  { %38 = dma.hbm_to_vmem [thread:$0]  %s2605_s1, 832, %s33_s16, [#allocation3], %s1996_s18, %s1996_s18, %s1997_s19  }
  0x19   :  { %s1998_s25 = smov [#allocation7]   ;;  %s1999_s27 = smov [#allocation8]  }
  0x1a   :  { %s66_s26 = sshll.u32 %s1998_s25, 4  ;;  %s80_s28 = sshll.u32 %s1999_s27, 4  ;;  %s67_s26 = int_to_ptr.vmem [resolvable:$true] %s66_s26  ;;  %s81_s28 = int_to_ptr.vmem [resolvable:$true] %s80_s28 }
  0x1b   :  { %s1892_s6 = scalar_lea.vmem %s67_s26, 192  ;;  %p1897_p11 = scmp.lt.s32.totalorder %s67_s26, %s67_s26 }
  0x1c   :  { %p1893_p10 = scmp.ne.s32.totalorder %s67_s26, %s1892_s6  ;;  %p1898_p12 = scmp.lt.s32.totalorder %s1892_s6, %s1892_s6 }
  0x1e   :  { %p1899_p13 = por %p1898_p12, %p1897_p11 }
  0x20   :  { %p1900_p0 = pnand %p1899_p13, %p1893_p10 }
  0x22   :  { %1903 = shalt.err (!%p1900_p0)
}
  0x23   :  { %72 = dma.hbm_to_vmem [thread:$0]  %s2612_s8, 192, %s67_s26, [#allocation6], %s1996_s18, %s1996_s18, %s1997_s19  }
  0x24   :  { %s1912_s1 = scalar_lea.vmem %s81_s28, 192  ;;  %p1917_p2 = scmp.lt.s32.totalorder %s81_s28, %s81_s28 }
  0x25   :  { %p1913_p1 = scmp.ne.s32.totalorder %s81_s28, %s1912_s1  ;;  %p1918_p3 = scmp.lt.s32.totalorder %s1912_s1, %s1912_s1 }
  0x27   :  { %p1919_p4 = por %p1918_p3, %p1917_p2 }
  0x29   :  { %p1920_p5 = pnand %p1919_p4, %p1913_p1 }
  0x2b   :  { %1923 = shalt.err (!%p1920_p5)
}
  0x2c   :  { %86 = dma.hbm_to_vmem [thread:$0]  %s2614_s10, 192, %s81_s28, [#allocation9], %s1996_s18, %s1996_s18, %s1997_s19  }
  0x2d   :  { %1984 = dma.done.wait [#allocation3], 832  }
  0x2e   :  { %1985 = vsyncadd [#allocation3], 4294966464 }
  0x2f   :  { %1986 = dma.done.wait [#allocation6], 1024  }
  0x30   :  { %1987 = vsyncadd [#allocation6], 4294966272 }
  0x31   :  { %1988 = dma.done.wait [#allocation9], 192  }
  0x32   :  { %1989 = vsyncadd [#allocation9], 4294967104  ;;  %v2000_v0 = vmov 0   ;;  %v104_v1 = vld [vmem:[%s2606_s2] sm:$0xff]  ;;  %v2001_v3 = vmov 0.0   ;;  %vm2002_vm0 = vmmov 0   ;;  %v105_v4 = vlaneseq }
  0x33   :  { %1789 = vset.pattern.permute.xlu0 %v2000_v0  ;;  %1790 = vset.pattern.permute.xlu1 %v2000_v0  ;;  %v119_v2 = vld [vmem:[%s2607_s3] sm:$0xff]  ;;  %vm186_vm1 = vcmask 130048   ;;  %v1793_v49 = vld [vmem:[%s2608_s4 + $0x8] sm:$0xff]   ;;  %v1795_v51 = vld [vmem:[%s2608_s4 + $0x10] sm:$0xff]   ;;  %vm537_vm2 = vcmask 1043456   ;;  %vm687_vm3 = vcmask 850944  }
  0x34   :  { %111 = vperm.xlu0 %1789, %v104_v1   ;;  %1602 = vmatprep.subr.bf16.mxu0 %v2001_v3  ;;  %v2119_v5 = vshrl.u32 %v105_v4, 7  ;;  %v2127_v7 = vld [vmem:[%s2604_s0] sm:$0xff]  ;;  %v1796_v52 = vld [vmem:[%s2609_s5 + $0x8] sm:$0xff]   ;;  %v1797_v53 = vld [vmem:[%s2608_s4 + $0x18] sm:$0xff]   ;;  %vm530_vm4 = vcmask 588800   ;;  %vm886_vm5 = vcmask 195584  }
  0x35   :  { %1772 = vmatprep.subr.bf16.mxu1 %v2001_v3  ;;  %1604 = vmatprep.mubr.msk.bf16.mxu0 %vm2002_vm0, %v2001_v3  ;;  %v1791_v40 = vld [vmem:[%s2608_s4] sm:$0xff]   ;;  %v1798_v54 = vld [vmem:[%s2609_s5 + $0x10] sm:$0xff]   ;;  %v1799_v55 = vld [vmem:[%s2609_s5 + $0x18] sm:$0xff]   ;;  %vm987_vm6 = vcmask 785408   ;;  %vm1206_vm7 = vcmask 261120   ;;  %s2003_s18 = smov [#allocation10]  }
  0x36   :  { %1620 = vmatprep.mubr.msk.bf16.mxu1 %vm2002_vm0, %v2001_v3  ;;  %v2122_v6 = vsub.s32 0, %v2119_v5  ;;  %v2132_v9 = vsub.s32 1, %v2119_v5  ;;  %v2135_v10 = vsub.s32 2, %v2119_v5  ;;  %v154_v27 = vsub.s32 4, %v2119_v5  ;;  %v1792_v41 = vld [vmem:[%s2608_s4 + $0x20] ss:$0 sps:$4 sm:$0xff]  }
  0x37   :  { %v159_v28 = vsub.s32 5, %v2119_v5  ;;  %v398_v31 = vsub.s32 6, %v2119_v5  ;;  %v403_v32 = vsub.s32 7, %v2119_v5  ;;  %v1794_v50 = vld [vmem:[%s2609_s5] sm:$0xff]   ;;  %v1801_v57 = vld [vmem:[#allocation2 + $0x30] ss:$0 sps:$4 sm:$0xff]  }
  0x38   :  { %126 = vperm.xlu0 %1789, %v119_v2   ;;  %v108_v8 = vrot.slane %v2127_v7, %v2122_v6  ;;  %v123_v13 = vrot.slane %v2127_v7, %v2132_v9  ;;  %v137_v14 = vrot.slane %v2127_v7, %v2135_v10  ;;  %v155_v29 = vrot.slane %v2127_v7, %v154_v27  ;;  %v1800_v56 = vld [vmem:[%s2609_s5 + $0x20] ss:$0 sps:$4 sm:$0xff]   ;;  %v1802_v59 = vld [vmem:[#allocation2 + $0x28] sm:$0xff]   ;;  %v1804_v61 = vld [vmem:[#allocation2 + $0x18] sm:$0xff]  }
  0x39   :  { %v160_v30 = vrot.slane %v2127_v7, %v159_v28  ;;  %v399_v36 = vrot.slane %v2127_v7, %v398_v31  ;;  %v404_v37 = vrot.slane %v2127_v7, %v403_v32  ;;  %v710_v58 = vsel %vm537_vm2, %v1801_v57, 0  ;;  %v1803_v60 = vld [vmem:[#allocation2 + $0x20] sm:$0xff]   ;;  %v1805_v62 = vld [vmem:[#allocation2 + $0x10] sm:$0xff]   ;;  %v1806_v63 = vld [vmem:[#allocation2 + $0x8] sm:$0xff]  }
  0x3a   :  { %v1807_v0 = vld [vmem:[#allocation2] sm:$0xff]   ;;  %v1808_v1 = vld [vmem:[#allocation5] sm:$0xff]  }
  0x3b   :  { %v1809_v2 = vld [vmem:[#allocation5 + $0x8] sm:$0xff]   ;;  %v1810_v4 = vld [vmem:[#allocation5 + $0x10] sm:$0xff]  }
  0xaf   :  { %v112_v11 = vpop.permute.xlu0 %111 }
  0xb0   :  { %v114_v12 = vsub.f32 %v108_v8, %v112_v11  ;;  %v1811_v8 = vld [vmem:[#allocation5 + $0x18] sm:$0xff]   ;;  %v1812_v11 = vld [vmem:[#allocation5 + $0x20] sm:$0xff]  }
  0xb2   :  { %v115_v15 = vmul.f32 %v114_v12, %v114_v12  ;;  %v1813_v12 = vld [vmem:[#allocation5 + $0x28] sm:$0xff]  }
  0xb3   :  { %v127_v16 = vpop.permute.xlu0 %126 }
  0xb4   :  { %v116_v17 = vmul.f32 -4.0, %v115_v15  ;;  %v129_v18 = vsub.f32 %v123_v13, %v127_v16  ;;  %v138_v19 = vsub.f32 %v137_v14, %v127_v16  ;;  %v1814_v13 = vld [vmem:[#allocation7] sm:$0xff]   ;;  %v1816_v14 = vld [vmem:[#allocation5 + $0x30] ss:$0 sps:$4 sm:$0xff]  }
  0xb5   :  { %v800_v15 = vld [vmem:[%s2611_s7] sm:$0xff] }
  0xb6   :  { %v117_v20 = vmul.f32 1.442695, %v116_v17  ;;  %v130_v21 = vmul.f32 %v129_v18, %v129_v18  ;;  %v139_v22 = vmul.f32 %v138_v19, %v138_v19  ;;  %803 = vperm.xlu1 %1790, %v800_v15  }
  0xb8   :  { %1838 = vpow2.f32 %v117_v20  ;;  %v131_v23 = vmul.f32 -4.0, %v130_v21  ;;  %v140_v24 = vmul.f32 -4.0, %v139_v22 }
  0xba   :  { %v132_v25 = vmul.f32 1.442695, %v131_v23  ;;  %v141_v26 = vmul.f32 1.442695, %v140_v24 }
  0xbc   :  { %1840 = vpow2.f32 %v132_v25 }
  0xbd   :  { %1842 = vpow2.f32 %v141_v26 }
  0xc5   :  { %v1839_v33 = vpop.eup %1838 }
  0xc6   :  { %v156_v34 = vmul.f32 %v1839_v33, %v155_v29  ;;  %v161_v35 = vmul.f32 %v1839_v33, %v160_v30 }
  0xc8   :  { %v162_v38 = vpack.c.bf16 %v161_v35, %v156_v34 }
  0xc9   :  { %v1841_v39 = vpop.eup %1840 }
  0xca   :  { %v1843_v42 = vpop.eup %1842  ;;  %1603 = vmatpush3.bf16.msra.mxu0 %v162_v38  ;;  %v283_v43 = vmul.f32 %v1841_v39, %v155_v29  ;;  %v284_v44 = vmul.f32 %v1841_v39, %v160_v30  ;;  %1773 = vmatpush3.bf16.msra.mxu1 %v162_v38 }
  0xcb   :  { %1624 = vmatprep.subr.bf16.mxu1 %v2001_v3  ;;  %1646 = vmatprep.subr.bf16.mxu0 %v2001_v3  ;;  %v400_v45 = vmul.f32 %v1843_v42, %v399_v36  ;;  %v405_v46 = vmul.f32 %v1843_v42, %v404_v37 }
  0xcc   :  { %v285_v47 = vpack.c.bf16 %v284_v44, %v283_v43 }
  0xcd   :  { %1605 = vmatmul.mubr.msk.bf16.vlgmr.msra.gmra.mxu0 %vm186_vm1, %v1791_v40  ;;  %1621 = vmatmul.mubr.msk.bf16.vlgmr.msra.gmra.mxu1 %vm186_vm1, %v1792_v41  ;;  %v406_v48 = vpack.c.bf16 %v405_v46, %v400_v45 }
  0xce   :  { %1625 = vmatpush3.bf16.msra.mxu1 %v285_v47  ;;  %1608 = vmatprep.mubr.msk.bf16.mxu0 %vm2002_vm0, %v2001_v3 }
  0xcf   :  { %1647 = vmatpush3.bf16.msra.mxu0 %v406_v48  ;;  %1626 = vmatprep.mubr.msk.bf16.mxu1 %vm2002_vm0, %v2001_v3 }
  0xd0   :  { %1682 = vmatprep.subr.bf16.mxu1 %v2001_v3 }
  0xd5   :  { %1609 = vmatmul.mubr.msk.bf16.gmra.mxu0 %vm186_vm1, %v1793_v49  ;;  %1627 = vmatmul.mubr.msk.bf16.vlgmr.msra.gmra.mxu1 %vm186_vm1, %v1794_v50 }
  0xd6   :  { %1612 = vmatprep.mubr.msk.bf16.mxu0 %vm2002_vm0, %v2001_v3  ;;  %1630 = vmatprep.mubr.msk.bf16.mxu1 %vm2002_vm0, %v2001_v3 }
  0xd7   :  { %1683 = vmatpush3.bf16.msra.mxu1 %v710_v58 }
  0xd8   :  { %1684 = vmatprep.subr.bf16.mxu1 %v2001_v3 }
  0xdb   :  { %1685 = vmatpush3.bf16.msra.mxu1 %v1802_v59 }
  0xdc   :  { %1686 = vmatprep.subr.bf16.mxu1 %v2001_v3 }
  0xdd   :  { %1613 = vmatmul.mubr.msk.bf16.gmra.mxu0 %vm186_vm1, %v1795_v51  ;;  %1631 = vmatmul.mubr.msk.bf16.gmra.mxu1 %vm186_vm1, %v1796_v52 }
  0xde   :  { %1616 = vmatprep.mubr.msk.bf16.mxu0 %vm2002_vm0, %v2001_v3  ;;  %1634 = vmatprep.mubr.msk.bf16.mxu1 %vm2002_vm0, %v2001_v3 }
  0xdf   :  { %1687 = vmatpush3.bf16.msra.mxu1 %v1803_v60 }
  0xe0   :  { %1688 = vmatprep.subr.bf16.mxu1 %v2001_v3 }
  0xe3   :  { %1689 = vmatpush3.bf16.msra.mxu1 %v1804_v61 }
  0xe4   :  { %1690 = vmatprep.subr.bf16.mxu1 %v2001_v3 }
  0xe5   :  { %1617 = vmatmul.mubr.msk.bf16.gmra.mxu0 %vm186_vm1, %v1797_v53  ;;  %1635 = vmatmul.mubr.msk.bf16.gmra.mxu1 %vm186_vm1, %v1798_v54 }
  0xe6   :  { %1638 = vmatprep.mubr.msk.bf16.mxu1 %vm2002_vm0, %v2001_v3  ;;  %1648 = vmatprep.mubr.msk.bf16.mxu0 %vm2002_vm0, %v2001_v3 }
  0xe7   :  { %1691 = vmatpush3.bf16.msra.mxu1 %v1805_v62 }
  0xe8   :  { %1692 = vmatprep.subr.bf16.mxu1 %v2001_v3 }
  0xeb   :  { %1693 = vmatpush3.bf16.msra.mxu1 %v1806_v63 }
  0xec   :  { %1694 = vmatprep.subr.bf16.mxu1 %v2001_v3 }
  0xed   :  { %1639 = vmatmul.mubr.msk.bf16.gmra.mxu1 %vm186_vm1, %v1799_v55  ;;  %1649 = vmatmul.mubr.msk.bf16.vlgmr.msra.gmra.mxu0 %vm186_vm1, %v1794_v50  ;;  %v502_v50 = vsub.s32 3, %v2119_v5 }
  0xee   :  { %1642 = vmatprep.mubr.msk.bf16.mxu1 %vm2002_vm0, %v2001_v3  ;;  %1652 = vmatprep.mubr.msk.bf16.mxu0 %vm2002_vm0, %v2001_v3 }
  0xef   :  { %1695 = vmatpush3.bf16.msra.mxu1 %v1807_v0 }
  0xf5   :  { %1643 = vmatmul.mubr.msk.bf16.gmra.mxu1 %vm186_vm1, %v1800_v56  ;;  %1653 = vmatmul.mubr.msk.bf16.gmra.mxu0 %vm186_vm1, %v1796_v52 }
  0xf6   :  { %1656 = vmatprep.mubr.msk.bf16.mxu0 %vm2002_vm0, %v2001_v3  ;;  %1696 = vmatprep.mubr.msk.bf16.mxu1 %vm2002_vm0, %v2001_v3 }
  0xfd   :  { %1657 = vmatmul.mubr.msk.bf16.gmra.mxu0 %vm186_vm1, %v1798_v54  ;;  %1697 = vmatmul.mubr.msk.bf16.vlgmr.msra.gmra.mxu1 %vm687_vm3, %v1808_v1 }
  0xfe   :  { %1660 = vmatprep.mubr.msk.bf16.mxu0 %vm2002_vm0, %v2001_v3  ;;  %1700 = vmatprep.mubr.msk.bf16.mxu1 %vm2002_vm0, %v2001_v3 }
 0x105   :  { %1661 = vmatmul.mubr.msk.bf16.gmra.mxu0 %vm186_vm1, %v1799_v55  ;;  %1701 = vmatmul.mubr.msk.bf16.gmra.mxu1 %vm687_vm3, %v1809_v2  ;;  %v503_v55 = vrot.slane %v2127_v7, %v502_v50 }
 0x106   :  { %1664 = vmatprep.mubr.msk.bf16.mxu0 %vm2002_vm0, %v2001_v3  ;;  %1704 = vmatprep.mubr.msk.bf16.mxu1 %vm2002_vm0, %v2001_v3 }
 0x10d   :  { %1665 = vmatmul.mubr.msk.bf16.gmra.mxu0 %vm186_vm1, %v1800_v56  ;;  %1705 = vmatmul.mubr.msk.bf16.gmra.mxu1 %vm687_vm3, %v1810_v4 }
 0x10e   :  { %1708 = vmatprep.mubr.msk.bf16.mxu1 %vm2002_vm0, %v2001_v3  ;;  %1678 = vmatprep.mubr.msk.bf16.mxu0 %vm530_vm4, %v1814_v13 }
 0x115   :  { %1709 = vmatmul.mubr.msk.bf16.gmra.mxu1 %vm687_vm3, %v1811_v8 }
 0x116   :  { %1712 = vmatprep.mubr.msk.bf16.mxu1 %vm2002_vm0, %v2001_v3 }
 0x11d   :  { %1713 = vmatmul.mubr.msk.bf16.gmra.mxu1 %vm687_vm3, %v1812_v11 }
 0x11e   :  { %1716 = vmatprep.mubr.msk.bf16.mxu1 %vm2002_vm0, %v2001_v3 }
 0x125   :  { %1717 = vmatmul.mubr.msk.bf16.gmra.mxu1 %vm687_vm3, %v1813_v12 }
 0x126   :  { %1720 = vmatprep.mubr.msk.bf16.mxu1 %vm2002_vm0, %v2001_v3 }
 0x12d   :  { %1721 = vmatmul.mubr.msk.bf16.gmra.mxu1 %vm687_vm3, %v1816_v14 }
 0x18d   :  { %v236_v16 = vpop.f32.mrf.mxu0  ;;  %v2255_v17 = vpop.f32.mrf.mxu1 }
 0x18f   :  { %v1606_v18 = vpop.f32.mrf.mxu0  ;;  %v1622_v19 = vpop.f32.mrf.mxu1 }
 0x191   :  { %v239_v20 = vpop.f32.mrf.mxu0  ;;  %v271_v21 = vpop.f32.mrf.mxu1 }
 0x193   :  { %v1607_v22 = vpop.f32.mrf.mxu0  ;;  %v1623_v23 = vpop.f32.mrf.mxu1 }
 0x195   :  { %v2257_v24 = vpop.f32.mrf.mxu0  ;;  %v358_v25 = vpop.f32.mrf.mxu1 }
 0x196   :  { %v479_v26 = vmul.f32 %v358_v25, %v236_v16  ;;  %v497_v16 = vmul.f32 2.0, %v2127_v7 }
 0x197   :  { %v1610_v27 = vpop.f32.mrf.mxu0  ;;  %v1628_v28 = vpop.f32.mrf.mxu1 }
 0x199   :  { %v2259_v29 = vpop.f32.mrf.mxu0  ;;  %v361_v30 = vpop.f32.mrf.mxu1 }
 0x19a   :  { %v480_v31 = vmul.f32 %v361_v30, %v239_v20  ;;  %v498_v20 = vmul.f32 %v497_v16, %v2127_v7 }
 0x19b   :  { %v1611_v32 = vpop.f32.mrf.mxu0  ;;  %v1629_v33 = vpop.f32.mrf.mxu1 }
 0x19c   :  { %v1448_v25 = vadd.f32 -1.0, %v498_v20 }
 0x19d   :  { %v252_v34 = vpop.f32.mrf.mxu0  ;;  %v2261_v35 = vpop.f32.mrf.mxu1 }
 0x19e   :  { %v507_v32 = vrot.slane %v1448_v25, %v502_v50  ;;  %v103_v25 = vld [vmem:[%s2604_s0 + $0x8] sm:$0x7] }
 0x19f   :  { %v1614_v36 = vpop.f32.mrf.mxu0  ;;  %v1632_v37 = vpop.f32.mrf.mxu1 }
 0x1a1   :  { %v255_v38 = vpop.f32.mrf.mxu0  ;;  %v2263_v39 = vpop.f32.mrf.mxu1 }
 0x1a3   :  { %v1615_v40 = vpop.f32.mrf.mxu0  ;;  %v1633_v41 = vpop.f32.mrf.mxu1 }
 0x1a5   :  { %v260_v42 = vpop.f32.mrf.mxu0  ;;  %v374_v43 = vpop.f32.mrf.mxu1 }
 0x1a6   :  { %v483_v36 = vmul.f32 %v374_v43, %v252_v34  ;;  %v482_v34 = vmul.f32 %v2263_v39, %v2259_v29 }
 0x1a7   :  { %v1618_v44 = vpop.f32.mrf.mxu0  ;;  %v1636_v45 = vpop.f32.mrf.mxu1 }
 0x1a9   :  { %v263_v46 = vpop.f32.mrf.mxu0  ;;  %v377_v47 = vpop.f32.mrf.mxu1 }
 0x1ab   :  { %v1619_v48 = vpop.f32.mrf.mxu0  ;;  %v1637_v49 = vpop.f32.mrf.mxu1 }
 0x1ad   :  { %v382_v51 = vpop.f32.mrf.mxu1  ;;  %v441_v52 = vpop.f32.mrf.mxu0 }
 0x1ae   :  { %v488_v61 = vmul.f32 %v479_v26, %v441_v52  ;;  %v485_v40 = vmul.f32 %v382_v51, %v260_v42 }
 0x1af   :  { %v1640_v53 = vpop.f32.mrf.mxu1  ;;  %v1650_v54 = vpop.f32.mrf.mxu0 }
 0x1b0   :  { %v481_v53 = vmul.f32 %v2261_v35, %v2257_v24  ;;  %v1815_v24 = vld [vmem:[#allocation7 + $0x8] ss:$0 sps:$4 sm:$0xff]  }
 0x1b1   :  { %v385_v56 = vpop.f32.mrf.mxu1  ;;  %v444_v57 = vpop.f32.mrf.mxu0 }
 0x1b2   :  { %v489_v58 = vmul.f32 %v480_v31, %v444_v57  ;;  %v486_v23 = vmul.f32 %v385_v56, %v263_v46  ;;  %v484_v31 = vmul.f32 %v377_v47, %v255_v38 }
 0x1b3   :  { %v1641_v59 = vpop.f32.mrf.mxu1  ;;  %v1651_v60 = vpop.f32.mrf.mxu0 }
 0x1b4   :  { %v508_v62 = vmul.f32 %v503_v55, %v489_v58 }
 0x1b5   :  { %v390_v63 = vpop.f32.mrf.mxu1  ;;  %v449_v0 = vpop.f32.mrf.mxu0 }
 0x1b6   :  { %v517_v1 = vpack.c.bf16 %v508_v62, %v488_v61  ;;  %v487_v27 = vmul.f32 %v390_v63, %v2255_v17  ;;  %v490_v42 = vmul.f32 %v481_v53, %v449_v0  ;;  %v810_v53 = vrot.slane %v103_v25, %v2122_v6 }
 0x1b7   :  { %v1654_v2 = vpop.f32.mrf.mxu0  ;;  %v1644_v4 = vpop.f32.mrf.mxu1 }
 0x1b8   :  { %v509_v54 = vmul.f32 %v507_v32, %v490_v42 }
 0x1b9   :  { %v452_v8 = vpop.f32.mrf.mxu0  ;;  %v393_v5 = vpop.f32.mrf.mxu1 }
 0x1ba   :  { %v491_v50 = vmul.f32 %v482_v34, %v452_v8 }
 0x1bb   :  { %v1655_v11 = vpop.f32.mrf.mxu0  ;;  %v1645_v12 = vpop.f32.mrf.mxu1 }
 0x1bc   :  { %v518_v56 = vpack.c.bf16 %v491_v50, %v509_v54 }
 0x1bd   :  { %v457_v13 = vpop.f32.mrf.mxu0  ;;  %v746_v29 = vpop.f32.mrf.mxu1 }
 0x1be   :  { %v492_v7 = vmul.f32 %v483_v36, %v457_v13 }
 0x1bf   :  { %v1658_v14 = vpop.f32.mrf.mxu0  ;;  %v1698_v35 = vpop.f32.mrf.mxu1 }
 0x1c0   :  { %v510_v43 = vmul.f32 %v503_v55, %v492_v7  ;;  %v804_v7 = vpop.permute.xlu1 %803 }
 0x1c1   :  { %v460_v15 = vpop.f32.mrf.mxu0  ;;  %v2280_v39 = vpop.f32.mrf.mxu1 }
 0x1c2   :  { %v493_v41 = vmul.f32 %v484_v31, %v460_v15 }
 0x1c3   :  { %v1659_v18 = vpop.f32.mrf.mxu0 }
 0x1c4   :  { %v511_v17 = vmul.f32 %v507_v32, %v493_v41 }
 0x1c5   :  { %v465_v19 = vpop.f32.mrf.mxu0 }
 0x1c6   :  { %v494_v49 = vmul.f32 %v485_v40, %v465_v19  ;;  %v519_v51 = vpack.c.bf16 %v511_v17, %v510_v43  ;;  %v815_v17 = vrot.slane %v103_v25, %v2132_v9 }
 0x1c7   :  { %v1662_v21 = vpop.f32.mrf.mxu0 }
 0x1c9   :  { %v468_v22 = vpop.f32.mrf.mxu0 }
 0x1ca   :  { %v495_v28 = vmul.f32 %v486_v23, %v468_v22  ;;  %v1821_v23 = vld [vmem:[%s2615_s11 + $0x4] ss:$12 sps:$4 sm:$0xff]  }
 0x1cb   :  { %v1663_v26 = vpop.f32.mrf.mxu0  ;;  %1254 = vmatprep.mubr.bf16.mxu1 %v1821_v23 }
 0x1cc   :  { %v512_v44 = vmul.f32 %v503_v55, %v495_v28  ;;  %v1699_v55 = vpop.f32.mrf.mxu1  ;;  %v829_v26 = vrot.slane %v103_v25, 1  ;;  %v822_v28 = vmul.f32 %v103_v25, %v103_v25 }
 0x1cd   :  { %v473_v30 = vpop.f32.mrf.mxu0 }
 0x1ce   :  { %v496_v33 = vmul.f32 %v487_v27, %v473_v30  ;;  %v520_v47 = vpack.c.bf16 %v512_v44, %v494_v49  ;;  %v2282_v57 = vpop.f32.mrf.mxu1  ;;  %v837_v27 = vrot.slane %v103_v25, 2  ;;  %v831_v30 = vmul.f32 %v829_v26, %v103_v25 }
 0x1cf   :  { %v1666_v37 = vpop.f32.mrf.mxu0  ;;  %v848_v36 = vrot.slane %v822_v28, %v2132_v9  ;;  %v858_v50 = vrot.slane %v822_v28, %v2135_v10 }
 0x1d0   :  { %v513_v45 = vmul.f32 %v507_v32, %v496_v33  ;;  %v1702_v58 = vpop.f32.mrf.mxu1  ;;  %v839_v31 = vmul.f32 %v837_v27, %v103_v25  ;;  %v826_v32 = vrot.slane %v822_v28, %v2122_v6  ;;  %v835_v33 = vrot.slane %v831_v30, %v2122_v6 }
 0x1d1   :  { %v476_v48 = vpop.f32.mrf.mxu0  ;;  %v853_v40 = vrot.slane %v831_v30, %v2132_v9  ;;  %v820_v9 = vrot.slane %v103_v25, %v2135_v10 }
 0x1d2   :  { %v521_v52 = vpack.c.bf16 %v513_v45, %v513_v45  ;;  %v2284_v59 = vpop.f32.mrf.mxu1  ;;  %v843_v37 = vrot.slane %v839_v31, %v2122_v6 }
 0x1d3   :  { %v1667_v46 = vpop.f32.mrf.mxu0 }
 0x1d4   :  { %1774 = vmatprep.subr.msk.bf16.mxu0 %vm537_vm2, %v521_v52  ;;  %v539_v38 = vsel %vm537_vm2, %v521_v52, 0  ;;  %v1703_v60 = vpop.f32.mrf.mxu1 }
 0x1d5   :  { %1669 = vmatpush3.bf16.msra.mxu0 %v539_v38 }
 0x1d6   :  { %1670 = vmatprep.subr.bf16.mxu0 %v520_v47  ;;  %v2286_v61 = vpop.f32.mrf.mxu1 }
 0x1d8   :  { %v1706_v62 = vpop.f32.mrf.mxu1 }
 0x1d9   :  { %1671 = vmatpush3.bf16.msra.mxu0 %v520_v47 }
 0x1da   :  { %1672 = vmatprep.subr.bf16.mxu0 %v519_v51  ;;  %v2288_v63 = vpop.f32.mrf.mxu1 }
 0x1dc   :  { %v1707_v0 = vpop.f32.mrf.mxu1 }
 0x1dd   :  { %1673 = vmatpush3.bf16.msra.mxu0 %v519_v51  ;;  %v2338_v51 = vadd.f32 %v804_v7, %v746_v29 }
 0x1de   :  { %1674 = vmatprep.subr.bf16.mxu0 %v518_v56 }
 0x1e1   :  { %1675 = vmatpush3.bf16.msra.mxu0 %v518_v56 }
 0x1e2   :  { %1676 = vmatprep.subr.bf16.mxu0 %v517_v1 }
 0x1e5   :  { %1677 = vmatpush3.bf16.msra.mxu0 %v517_v1  ;;  %v2290_v1 = vpop.f32.mrf.mxu1 }
 0x1e6   :  { %1724 = vmatprep.subr.bf16.mxu0 %v2001_v3 }
 0x1e7   :  { %v1710_v2 = vpop.f32.mrf.mxu1 }
 0x1e8   :  { %1679 = vmatmul.mubr.msk.bf16.vlgmr.msra.gmra.mxu0 %vm530_vm4, %v1815_v24 }
 0x1e9   :  { %1728 = vmatprep.mubr.msk.bf16.mxu0 %vm2002_vm0, %v2001_v3  ;;  %v2292_v4 = vpop.f32.mrf.mxu1 }
 0x1eb   :  { %v1711_v8 = vpop.f32.mrf.mxu1 }
 0x1ed   :  { %v2294_v5 = vpop.f32.mrf.mxu1 }
 0x1ef   :  { %v1714_v11 = vpop.f32.mrf.mxu1 }
 0x1f1   :  { %v2296_v12 = vpop.f32.mrf.mxu1 }
 0x1f3   :  { %v1715_v13 = vpop.f32.mrf.mxu1 }
 0x1f5   :  { %v2298_v14 = vpop.f32.mrf.mxu1 }
 0x1f7   :  { %v1718_v15 = vpop.f32.mrf.mxu1 }
 0x1f9   :  { %v2300_v16 = vpop.f32.mrf.mxu1 }
 0x1fb   :  { %v1719_v18 = vpop.f32.mrf.mxu1 }
 0x1fd   :  { %v2302_v19 = vpop.f32.mrf.mxu1 }
 0x1ff   :  { %v1722_v20 = vpop.f32.mrf.mxu1 }
 0x201   :  { %v797_v21 = vpop.f32.mrf.mxu1 }
 0x203   :  { %v1723_v22 = vpop.f32.mrf.mxu1 }
 0x2a8   :  { %v1680_v41 = vpop.f32.mrf.mxu0 }
 0x2a9   :  { %v2315_v44 = vmul.f32 %v1680_v41, %v826_v32  ;;  %v2317_v45 = vmul.f32 %v1680_v41, %v835_v33  ;;  %v2319_v48 = vmul.f32 %v1680_v41, %v848_v36  ;;  %v2321_v49 = vmul.f32 %v1680_v41, %v843_v37 }
 0x2aa   :  { %v2323_v52 = vmul.f32 %v1680_v41, %v853_v40  ;;  %v2325_v46 = vpop.f32.mrf.mxu0  ;;  %v2375_v22 = vmul.f32 %v1680_v41, %v858_v50 }
 0x2ab   :  { %v1091_v38 = vmul.f32 %v2317_v45, %v2298_v14  ;;  %v1092_v47 = vmul.f32 %v2319_v48, %v2300_v16  ;;  %v1065_v34 = vmul.f32 %v2315_v44, %v2292_v4  ;;  %v1066_v43 = vmul.f32 %v2317_v45, %v2294_v5 }
 0x2ac   :  { %v1681_v42 = vpop.f32.mrf.mxu0  ;;  %v1094_v56 = vmul.f32 %v2323_v52, %v2302_v19  ;;  %v1068_v35 = vmul.f32 %v2321_v49, %v2296_v12  ;;  %v1084_v60 = vmul.f32 %v2315_v44, %v2298_v14  ;;  %v1085_v29 = vmul.f32 %v2317_v45, %v2300_v16 }
 0x2ad   :  { %v1093_v6 = vadd.f32 %v1092_v47, %v1091_v38  ;;  %v1067_v24 = vadd.f32 %v1066_v43, %v1065_v34  ;;  %v2355_v10 = vmul.f32 %v2323_v52, %v2338_v51  ;;  %v1089_v62 = vmul.f32 %v2300_v16, %v2325_v46 }
 0x2ae   :  { %v578_v54 = vpop.f32.mrf.mxu0  ;;  %v2361_v0 = vmul.f32 %v2317_v45, %v2338_v51  ;;  %v1063_v2 = vmul.f32 %v2292_v4, %v2325_v46  ;;  %v1058_v20 = vmul.f32 %v2321_v49, %v2286_v61  ;;  %v1059_v21 = vmul.f32 %v2323_v52, %v2288_v63 }
 0x2af   :  { %v2345_v55 = vmul.f32 %v810_v53, %v578_v54  ;;  %v2347_v58 = vmul.f32 %v815_v17, %v578_v54  ;;  %v1095_v11 = vadd.f32 %v1094_v56, %v1093_v6  ;;  %v1069_v15 = vadd.f32 %v1068_v35, %v1067_v24 }
 0x2b0   :  { %v2369_v18 = vmul.f32 %v820_v9, %v578_v54  ;;  %v1086_v26 = vadd.f32 %v1085_v29, %v1084_v60  ;;  %v866_v27 = vmul.f32 %v2315_v44, %v2286_v61  ;;  %v867_v28 = vmul.f32 %v2317_v45, %v2288_v63 }
 0x2b1   :  { %v1090_v8 = vmul.f32 %v2347_v58, %v2284_v59  ;;  %v1064_v13 = vmul.f32 %v2345_v55, %v2282_v57  ;;  %v1132_v30 = vpack.c.bf16 %v1089_v62, %v2355_v10  ;;  %v1124_v31 = vpack.c.bf16 %v1063_v2, %v2361_v0 }
 0x2b2   :  { %v1083_v32 = vmul.f32 %v2345_v55, %v2284_v59  ;;  %v1087_v33 = vmul.f32 %v2321_v49, %v2302_v19  ;;  %v1057_v36 = vmul.f32 %v2369_v18, %v2280_v39  ;;  %v1060_v37 = vadd.f32 %v1059_v21, %v1058_v20 }
 0x2b3   :  { %v1133_v23 = vpack.c.bf16 %v1095_v11, %v1090_v8  ;;  %v1125_v25 = vpack.c.bf16 %v1069_v15, %v1064_v13  ;;  %v868_v40 = vadd.f32 %v867_v28, %v866_v27  ;;  %v869_v41 = vmul.f32 %v2321_v49, %v2290_v1 }
 0x2b4   :  { %v1088_v7 = vadd.f32 %v1087_v33, %v1086_v26  ;;  %v1061_v53 = vmul.f32 %v2375_v22, %v2290_v1  ;;  %v1055_v17 = vmul.f32 %v2321_v49, %v2338_v51  ;;  %v1082_v38 = vmul.f32 %v2298_v14, %v2325_v46 }
 0x2b5   :  { %1549 = vmatprep.subr.bf16.mxu1 %v1133_v23  ;;  %v2397_v47 = vadd.f32 %v869_v41, %v868_v40  ;;  %v871_v34 = vmul.f32 %v2317_v45, %v2292_v4  ;;  %v1077_v42 = vmul.f32 %v2321_v49, %v2292_v4  ;;  %v1078_v43 = vmul.f32 %v2323_v52, %v2294_v5 }
 0x2b6   :  { %1550 = vmatpush3.bf16.msra.mxu1 %v1125_v25  ;;  %v1131_v50 = vpack.c.bf16 %v1088_v7, %v1083_v32  ;;  %v1062_v6 = vadd.f32 %v1061_v53, %v1060_v37  ;;  %v873_v9 = vmul.f32 %v2319_v48, %v2294_v5  ;;  %v1130_v56 = vpack.c.bf16 %v1082_v38, %v1055_v17 }
 0x2b7   :  { %1551 = vmatprep.subr.bf16.mxu1 %v1132_v30  ;;  %v872_v54 = vadd.f32 %v871_v34, %v2397_v47  ;;  %v1079_v24 = vadd.f32 %v1078_v43, %v1077_v42  ;;  %v875_v29 = vmul.f32 %v2323_v52, %v2296_v12  ;;  %v1056_v62 = vmul.f32 %v2290_v1, %v2325_v46 }
 0x2b8   :  { %v1123_v35 = vpack.c.bf16 %v1062_v6, %v1057_v36  ;;  %v2414_v2 = vmul.f32 %v2321_v49, %v2298_v14  ;;  %v1076_v8 = vmul.f32 %v2369_v18, %v2282_v57  ;;  %v1080_v11 = vmul.f32 %v2375_v22, %v2296_v12 }
 0x2b9   :  { %v874_v60 = vadd.f32 %v873_v9, %v872_v54  ;;  %v1050_v13 = vmul.f32 %v2317_v45, %v2286_v61  ;;  %v2424_v20 = vmul.f32 %v2323_v52, %v2300_v16  ;;  %v2428_v21 = vmul.f32 %v2345_v55, %v2280_v39 }
 0x2ba   :  { %1552 = vmatpush3.bf16.msra.mxu1 %v1124_v31  ;;  %v862_v23 = vmul.f32 %v2347_v58, %v2282_v57  ;;  %v1081_v25 = vadd.f32 %v1080_v11, %v1079_v24  ;;  %v965_v26 = vmul.f32 %v2345_v55, %v2298_v14  ;;  %v966_v27 = vmul.f32 %v2347_v58, %v2300_v16 }
 0x2bb   :  { %1553 = vmatprep.subr.bf16.mxu1 %v1131_v50  ;;  %v876_v15 = vadd.f32 %v875_v29, %v874_v60  ;;  %v1051_v28 = vmul.f32 %v2319_v48, %v2288_v63  ;;  %v1122_v31 = vpack.c.bf16 %v1056_v62, %v1055_v17  ;;  %v960_v32 = vmul.f32 %v2321_v49, %v2280_v39 }
 0x2bc   :  { %v961_v33 = vmul.f32 %v2323_v52, %v2282_v57  ;;  %v1129_v36 = vpack.c.bf16 %v1081_v25, %v1076_v8  ;;  %v1049_v37 = vmul.f32 %v2347_v58, %v2280_v39  ;;  %v1053_v16 = vmul.f32 %v2323_v52, %v2290_v1 }
 0x2bd   :  { %v878_v30 = vadd.f32 %v2414_v2, %v876_v15  ;;  %v1052_v14 = vadd.f32 %v1051_v28, %v1050_v13  ;;  %v2450_v41 = vmul.f32 %v2375_v22, %v2302_v19  ;;  %v1075_v7 = vmul.f32 %v2296_v12, %v2325_v46 }
 0x2be   :  { %1554 = vmatpush3.bf16.msra.mxu1 %v1123_v35  ;;  %v863_v53 = vadd.f32 %v862_v23, %v2428_v21  ;;  %v967_v17 = vadd.f32 %v966_v27, %v965_v26  ;;  %v2458_v43 = vmul.f32 %v2369_v18, %v2284_v59  ;;  %v1072_v50 = vadd.f32 %v873_v9, %v871_v34 }
 0x2bf   :  { %1555 = vmatprep.subr.bf16.mxu1 %v1130_v56  ;;  %v880_v40 = vadd.f32 %v2424_v20, %v878_v30  ;;  %v1054_v38 = vadd.f32 %v1053_v16, %v1052_v14  ;;  %v962_v6 = vadd.f32 %v961_v33, %v960_v32  ;;  %v968_v54 = vmul.f32 %v2369_v18, %v2302_v19  ;;  %v1817_v14 = vld [vmem:[#allocation8] sm:$0xff]  }
 0x2c0   :  { %v1048_v24 = vmul.f32 %v2288_v63, %v2325_v46  ;;  %v1128_v60 = vpack.c.bf16 %v1075_v7, %v2355_v10  ;;  %v865_v62 = vadd.f32 %v2458_v43, %v863_v53  ;;  %v963_v8 = vmul.f32 %v2375_v22, %v2284_v59 }
 0x2c1   :  { %v882_v42 = vadd.f32 %v2450_v41, %v880_v40  ;;  %v1121_v56 = vpack.c.bf16 %v1054_v38, %v1049_v37  ;;  %v969_v11 = vadd.f32 %v968_v54, %v967_v17  ;;  %v1073_v9 = vadd.f32 %v1072_v50, %v875_v29 }
 0x2c2   :  { %1556 = vmatpush3.bf16.msra.mxu1 %v1122_v31  ;;  %v953_v13 = vmul.f32 %v2345_v55, %v2292_v4  ;;  %v954_v15 = vmul.f32 %v2347_v58, %v2294_v5  ;;  %v860_v10 = vmul.f32 %v2338_v51, %v2325_v46  ;;  %v964_v25 = vadd.f32 %v963_v8, %v962_v6  ;;  %v1819_v6 = vld [vmem:[%s2615_s11] ss:$12 sps:$4 sm:$0xff]   ;;  %v1825_v8 = vld [vmem:[%s2615_s11 + $0x18] ss:$12 sps:$4 sm:$0xff]  }
 0x2c3   :  { %1557 = vmatprep.subr.bf16.mxu1 %v1129_v36  ;;  %v885_v35 = vpack.c.bf16 %v882_v42, %v882_v42  ;;  %v1120_v26 = vpack.c.bf16 %v1048_v24, %v2361_v0  ;;  %v948_v27 = vmul.f32 %v2317_v45, %v2280_v39  ;;  %v1127_v28 = vpack.c.bf16 %v1073_v9, %v862_v23  ;;  %v883_v23 = vld [vmem:[%s2613_s9] sm:$0xf]  ;;  %v1818_v9 = vld [vmem:[#allocation8 + $0x8] ss:$0 sps:$4 sm:$0xff]   ;;  %s1381_s9 = sshll.u32 %s2003_s18, 4  ;;  %s1382_s9 = int_to_ptr.vmem [resolvable:$true] %s1381_s9 }
 0x2c4   :  { %v949_v29 = vmul.f32 %v2319_v48, %v2282_v57  ;;  %v1070_v4 = vmul.f32 %v2319_v48, %v2338_v51  ;;  %v1071_v30 = vmul.f32 %v2294_v5, %v2325_v46  ;;  %v884_v31 = vpack.c.bf16 %v865_v62, %v860_v10  ;;  %v1830_v10 = vld [vmem:[%s2615_s11 + $0x38] ss:$12 sps:$4 sm:$0xff]   ;;  %s1924_s19 = scalar_lea.vmem %s1382_s9, 128  ;;  %p1929_p7 = scmp.lt.s32.totalorder %s1382_s9, %s1382_s9 }
 0x2c5   :  { %v891_v34 = vsel %vm537_vm2, %v885_v35, 0  ;;  %v958_v32 = vmul.f32 %v2369_v18, %v2338_v51  ;;  %v978_v0 = vpack.c.bf16 %v969_v11, %v964_v25  ;;  %v955_v33 = vadd.f32 %v954_v15, %v953_v13  ;;  %v1116_v15 = vld [vmem:[%s2615_s11 + $0x60] sm:$0xff]  ;;  %v1834_v25 = vld [vmem:[%s2615_s11 + $0x50] ss:$12 sps:$4 sm:$0xff]   ;;  %p1925_p6 = scmp.ne.s32.totalorder %s1382_s9, %s1924_s19  ;;  %p1930_p8 = scmp.lt.s32.totalorder %s1924_s19, %s1924_s19 }
 0x2c6   :  { %1558 = vmatpush3.bf16.msra.mxu1 %v1121_v56  ;;  %1725 = vmatpush3.bf16.msra.mxu0 %v891_v34  ;;  %v959_v48 = vmul.f32 %v2284_v59, %v2325_v46  ;;  %v1119_v5 = vpack.c.bf16 %v2397_v47, %v2428_v21  ;;  %v1045_v36 = vmul.f32 %v2315_v44, %v2338_v51  ;;  %v1829_v34 = vld [vmem:[%s2615_s11 + $0x30] ss:$12 sps:$4 sm:$0xff]  }
 0x2c7   :  { %1559 = vmatprep.subr.bf16.mxu1 %v1128_v60  ;;  %1726 = vmatprep.subr.bf16.mxu0 %v2001_v3  ;;  %v1046_v37 = vmul.f32 %v2286_v61, %v2325_v46  ;;  %v950_v16 = vadd.f32 %v949_v29, %v948_v27  ;;  %v956_v40 = vmul.f32 %v2369_v18, %v2296_v12  ;;  %p1931_p9 = por %p1930_p8, %p1929_p7 }
 0x2c8   :  { %v1126_v7 = vpack.c.bf16 %v1071_v30, %v1070_v4  ;;  %v977_v53 = vpack.c.bf16 %v959_v48, %v958_v32  ;;  %v951_v17 = vmul.f32 %v2323_v52, %v2284_v59  ;;  %v941_v21 = vmul.f32 %v2345_v55, %v2286_v61  ;;  %v1823_v61 = vld [vmem:[%s2615_s11 + $0x1c] ss:$12 sps:$4 sm:$0xff]  }
 0x2c9   :  { %v957_v47 = vadd.f32 %v956_v40, %v955_v33  ;;  %v942_v38 = vmul.f32 %v2347_v58, %v2288_v63  ;;  %v1118_v42 = vpack.c.bf16 %v1046_v37, %v1045_v36  ;;  %v936_v52 = vmul.f32 %v2315_v44, %v2280_v39  ;;  %p1932_p10 = pnand %p1931_p9, %p1925_p6 }
 0x2ca   :  { %1560 = vmatpush3.bf16.msra.mxu1 %v1120_v26  ;;  %1727 = vmatpush3.bf16.msra.mxu0 %v884_v31  ;;  %v952_v12 = vadd.f32 %v951_v17, %v950_v16  ;;  %v937_v50 = vmul.f32 %v2317_v45, %v2282_v57  ;;  %v946_v54 = vmul.f32 %v2347_v58, %v2338_v51  ;;  %v1837_v26 = vld [vmem:[%s2615_s11 + $0x68] ss:$0 sps:$4 sm:$0xff]  }
 0x2cb   :  { %1561 = vmatprep.subr.bf16.mxu1 %v1127_v28  ;;  %1732 = vmatprep.subr.bf16.mxu0 %v978_v0  ;;  %v943_v56 = vadd.f32 %v942_v38, %v941_v21  ;;  %v947_v44 = vmul.f32 %v2282_v57, %v2325_v46  ;;  %v944_v24 = vmul.f32 %v2369_v18, %v2290_v1  ;;  %v1827_v57 = vld [vmem:[%s2615_s11 + $0x34] ss:$12 sps:$4 sm:$0xff]  }
 0x2cc   :  { %v976_v63 = vpack.c.bf16 %v957_v47, %v952_v12  ;;  %v938_v45 = vadd.f32 %v937_v50, %v936_v52  ;;  %v939_v60 = vmul.f32 %v2321_v49, %v2284_v59  ;;  %v934_v1 = vmul.f32 %v2345_v55, %v2338_v51  ;;  %v1831_v55 = vld [vmem:[%s2615_s11 + $0x4c] ss:$12 sps:$4 sm:$0xff]  }
 0x2cd   :  { %1729 = vmatmul.mubr.msk.bf16.vlgmr.msra.gmra.mxu0 %vm886_vm5, %v883_v23  ;;  %v975_v35 = vpack.c.bf16 %v947_v44, %v946_v54  ;;  %v945_v62 = vadd.f32 %v944_v24, %v943_v56  ;;  %v935_v59 = vmul.f32 %v2280_v39, %v2325_v46  ;;  %v1098_v18 = vadd.f32 %v2424_v20, %v2414_v2 }
 0x2ce   :  { %1562 = vmatpush3.bf16.msra.mxu1 %v1119_v5  ;;  %1733 = vmatpush3.bf16.msra.mxu0 %v978_v0  ;;  %v940_v58 = vadd.f32 %v939_v60, %v938_v45  ;;  %v1097_v13 = vmul.f32 %v2302_v19, %v2325_v46  ;;  %v1096_v20 = vmul.f32 %v2375_v22, %v2338_v51  ;;  %v1833_v19 = vld [vmem:[%s2615_s11 + $0x48] ss:$12 sps:$4 sm:$0xff]  }
 0x2cf   :  { %1563 = vmatprep.subr.bf16.mxu1 %v1126_v7  ;;  %1744 = vmatprep.mubr.msk.bf16.mxu0 %vm987_vm6, %v1817_v14  ;;  %v973_v49 = vpack.c.bf16 %v935_v59, %v934_v1  ;;  %v1099_v39 = vadd.f32 %v1098_v18, %v2450_v41  ;;  %v1492_v41 = vcombine.high %v1116_v15, %v1116_v15  ;;  %v1822_v51 = vld [vmem:[%s2615_s11 + $0x8] ss:$12 sps:$4 sm:$0xff]  }
 0x2d0   :  { %1734 = vmatprep.subr.bf16.mxu0 %v977_v53  ;;  %v974_v11 = vpack.c.bf16 %v945_v62, %v940_v58  ;;  %v1134_v46 = vpack.c.bf16 %v1097_v13, %v1096_v20  ;;  %v1491_v22 = vcombine.low %v1116_v15, %v1116_v15 }
 0x2d1   :  { %v1135_v2 = vpack.c.bf16 %v1099_v39, %v2458_v43  ;;  %v1826_v43 = vld [vmem:[%s2615_s11 + $0x20] ss:$12 sps:$4 sm:$0xff]  }
 0x2d2   :  { %1564 = vmatpush3.bf16.msra.mxu1 %v1118_v42  ;;  %1735 = vmatpush3.bf16.msra.mxu0 %v977_v53 }
 0x2d3   :  { %1736 = vmatprep.subr.bf16.mxu0 %v976_v63 }
 0x2d5   :  { %1255 = vmatmul.mubr.bf16.vlgmr.msra.gmra.mxu1 %v1819_v6 }
 0x2d6   :  { %1262 = vmatprep.mubr.bf16.mxu1 %v1823_v61  ;;  %1737 = vmatpush3.bf16.msra.mxu0 %v976_v63 }
 0x2d7   :  { %1738 = vmatprep.subr.bf16.mxu0 %v975_v35 }
 0x2da   :  { %1739 = vmatpush3.bf16.msra.mxu0 %v975_v35 }
 0x2db   :  { %1740 = vmatprep.subr.bf16.mxu0 %v974_v11 }
 0x2dd   :  { %1263 = vmatmul.mubr.bf16.gmra.mxu1 %v1825_v8 }
 0x2de   :  { %1270 = vmatprep.mubr.bf16.mxu1 %v1827_v57  ;;  %1741 = vmatpush3.bf16.msra.mxu0 %v974_v11 }
 0x2df   :  { %1742 = vmatprep.subr.bf16.mxu0 %v973_v49 }
 0x2e2   :  { %1743 = vmatpush3.bf16.msra.mxu0 %v973_v49 }
 0x2e3   :  { %1748 = vmatprep.subr.bf16.mxu0 %v2001_v3 }
 0x2e5   :  { %1271 = vmatmul.mubr.bf16.gmra.mxu1 %v1829_v34  ;;  %1745 = vmatmul.mubr.msk.bf16.vlgmr.msra.gmra.mxu0 %vm987_vm6, %v1818_v9 }
 0x2e6   :  { %1278 = vmatprep.mubr.bf16.mxu1 %v1831_v55  ;;  %1749 = vmatpush3.bf16.msra.mxu0 %v1135_v2 }
 0x2e7   :  { %1752 = vmatprep.mubr.msk.bf16.mxu0 %vm2002_vm0, %v2001_v3  ;;  %1750 = vmatprep.subr.bf16.mxu0 %v2001_v3 }
 0x2ea   :  { %1751 = vmatpush3.bf16.msra.mxu0 %v1134_v46 }
 0x2ed   :  { %1279 = vmatmul.mubr.bf16.gmra.mxu1 %v1833_v19  ;;  %1753 = vmatmul.mubr.msk.bf16.vlgmr.msra.gmra.mxu0 %vm1206_vm7, %v1822_v51 }
 0x2ee   :  { %1286 = vmatprep.mubr.bf16.mxu1 %v1492_v41  ;;  %1756 = vmatprep.mubr.msk.bf16.mxu0 %vm2002_vm0, %v2001_v3 }
 0x2f5   :  { %1287 = vmatmul.mubr.bf16.gmra.mxu1 %v1491_v22  ;;  %1757 = vmatmul.mubr.msk.bf16.gmra.mxu0 %vm1206_vm7, %v1826_v43 }
 0x2f6   :  { %1760 = vmatprep.mubr.msk.bf16.mxu0 %vm2002_vm0, %v2001_v3 }
 0x2fd   :  { %1761 = vmatmul.mubr.msk.bf16.gmra.mxu0 %vm1206_vm7, %v1830_v10 }
 0x2fe   :  { %1764 = vmatprep.mubr.msk.bf16.mxu0 %vm2002_vm0, %v2001_v3 }
 0x305   :  { %1765 = vmatmul.mubr.msk.bf16.gmra.mxu0 %vm1206_vm7, %v1834_v25 }
 0x306   :  { %1768 = vmatprep.mubr.msk.bf16.mxu0 %vm2002_vm0, %v2001_v3 }
 0x30d   :  { %1769 = vmatmul.mubr.msk.bf16.gmra.mxu0 %vm1206_vm7, %v1837_v26 }
 0x38d   :  { %v927_v27 = vpop.f32.mrf.mxu0 }
 0x38e   :  { %933 = vst [vmem:[#allocation10] sm:$0xff] %v927_v27 }
 0x38f   :  { %v1730_v28 = vpop.f32.mrf.mxu0 }
 0x390   :  { %1935 = shalt.err (!%p1932_p10)
}
 0x391   :  { %1384 = dma.vmem_to_hbm [thread:$0]  %s1382_s9, 128, %s2616_s12, [#allocation4]   ;;  %v930_v3 = vpop.f32.mrf.mxu0 }
 0x392   :  { %s2004_s11 = smov [#allocation11]  }
 0x393   :  { %v1731_v29 = vpop.f32.mrf.mxu0  ;;  %s1390_s24 = sshll.u32 %s2004_s11, 4  ;;  %s1391_s24 = int_to_ptr.vmem [resolvable:$true] %s1390_s24 }
 0x394   :  { %s1944_s12 = scalar_lea.vmem %s1391_s24, 384  ;;  %p1949_p12 = scmp.lt.s32.totalorder %s1391_s24, %s1391_s24 }
 0x395   :  { %v1565_v4 = vpop.f32.mrf.mxu1  ;;  %p1945_p11 = scmp.ne.s32.totalorder %s1391_s24, %s1944_s12  ;;  %p1950_p13 = scmp.lt.s32.totalorder %s1944_s12, %s1944_s12 }
 0x397   :  { %v1566_v30 = vpop.f32.mrf.mxu1  ;;  %p1951_p0 = por %p1950_p13, %p1949_p12 }
 0x398   :  { %v1567_v53 = vadd.f32 %v1566_v30, %v1565_v4 }
 0x399   :  { %v1568_v31 = vpop.f32.mrf.mxu1  ;;  %p1952_p1 = pnand %p1951_p0, %p1945_p11 }
 0x39b   :  { %v1569_v32 = vpop.f32.mrf.mxu1 }
 0x39d   :  { %v1571_v0 = vpop.f32.mrf.mxu1 }
 0x39f   :  { %v1572_v33 = vpop.f32.mrf.mxu1 }
 0x3a1   :  { %v1574_v23 = vpop.f32.mrf.mxu1 }
 0x3a3   :  { %v1575_v48 = vpop.f32.mrf.mxu1 }
 0x3a5   :  { %v1577_v5 = vpop.f32.mrf.mxu1  ;;  %v1746_v36 = vpop.f32.mrf.mxu0 }
 0x3a6   :  { %1044 = vst [vmem:[#allocation11 + $0x10] sm:$0xff] %v1746_v36 }
 0x3a7   :  { %v1578_v37 = vpop.f32.mrf.mxu1  ;;  %v1028_v14 = vpop.f32.mrf.mxu0 }
 0x3a8   :  { %1042 = vst [vmem:[#allocation11] sm:$0xff] %v1028_v14 }
 0x3a9   :  { %v1580_v16 = vpop.f32.mrf.mxu1  ;;  %v1747_v40 = vpop.f32.mrf.mxu0 }
 0x3ab   :  { %v1581_v7 = vpop.f32.mrf.mxu1  ;;  %v1031_v17 = vpop.f32.mrf.mxu0 }
 0x3ac   :  { %1043 = vst [vmem:[#allocation11 + $0x8] sm:$0xff] %v1031_v17 }
 0x3ad   :  { %v1583_v47 = vpop.f32.mrf.mxu1  ;;  %v1328_v21 = vpop.f32.mrf.mxu0 }
 0x3af   :  { %v1584_v38 = vpop.f32.mrf.mxu1 }
 0x3b0   :  { %1955 = shalt.err (!%p1952_p1)
}
 0x3b1   :  { %s2005_s25 = smov 128   ;;  %s2006_s26 = smov 8   ;;  %v1329_v42 = vadd.f32 %v1567_v53, %v1328_v21  ;;  %v1754_v12 = vpop.f32.mrf.mxu0  ;;  %v1586_v52 = vpop.f32.mrf.mxu1  ;;  %v1570_v50 = vadd.f32 %v1569_v32, %v1568_v31  ;;  %v1573_v54 = vadd.f32 %v1572_v33, %v1571_v0  ;;  %v1576_v58 = vadd.f32 %v1575_v48, %v1574_v23 }
 0x3b2   :  { %1396 = dma.vmem_to_hbm [thread:$0]  %s1391_s24, 384, %s2617_s13, [#allocation12], %s2005_s25, %s2005_s25, %s2006_s26   ;;  %v1579_v1 = vadd.f32 %v1578_v37, %v1577_v5  ;;  %v1582_v55 = vadd.f32 %v1581_v7, %v1580_v16  ;;  %v1585_v13 = vadd.f32 %v1584_v38, %v1583_v47 }
 0x3b3   :  { %1366 = vst [vmem:[#allocation13] sm:$0xff] %v1329_v42  ;;  %v1331_v6 = vpop.f32.mrf.mxu0  ;;  %v1587_v61 = vpop.f32.mrf.mxu1  ;;  %s2007_s13 = smov [#allocation13]  }
 0x3b4   :  { %v1332_v63 = vadd.f32 %v1570_v50, %v1331_v6  ;;  %v1588_v46 = vadd.f32 %v1587_v61, %v1586_v52  ;;  %s1402_s6 = sshll.u32 %s2007_s13, 4  ;;  %s1403_s6 = int_to_ptr.vmem [resolvable:$true] %s1402_s6 }
 0x3b5   :  { %v1755_v56 = vpop.f32.mrf.mxu0  ;;  %v1589_v44 = vpop.f32.mrf.mxu1  ;;  %s1964_s29 = scalar_lea.vmem %s1403_s6, 1152  ;;  %p1969_p3 = scmp.lt.s32.totalorder %s1403_s6, %s1403_s6 }
 0x3b6   :  { %1367 = vst [vmem:[#allocation13 + $0x8] sm:$0xff] %v1332_v63  ;;  %p1965_p2 = scmp.ne.s32.totalorder %s1403_s6, %s1964_s29  ;;  %p1970_p4 = scmp.lt.s32.totalorder %s1964_s29, %s1964_s29 }
 0x3b7   :  { %v1336_v45 = vpop.f32.mrf.mxu0  ;;  %v1590_v24 = vpop.f32.mrf.mxu1 }
 0x3b8   :  { %v1337_v35 = vadd.f32 %v1573_v54, %v1336_v45  ;;  %v1591_v22 = vadd.f32 %v1590_v24, %v1589_v44  ;;  %p1971_p5 = por %p1970_p4, %p1969_p3 }
 0x3b9   :  { %v1758_v60 = vpop.f32.mrf.mxu0  ;;  %v1592_v62 = vpop.f32.mrf.mxu1 }
 0x3ba   :  { %1368 = vst [vmem:[#allocation13 + $0x10] sm:$0xff] %v1337_v35  ;;  %p1972_p6 = pnand %p1971_p5, %p1965_p2 }
 0x3bb   :  { %v1339_v8 = vpop.f32.mrf.mxu0  ;;  %v1593_v57 = vpop.f32.mrf.mxu1 }
 0x3bc   :  { %v1340_v11 = vadd.f32 %v1576_v58, %v1339_v8 }
 0x3bd   :  { %v1759_v59 = vpop.f32.mrf.mxu0 }
 0x3be   :  { %1369 = vst [vmem:[#allocation13 + $0x18] sm:$0xff] %v1340_v11 }
 0x3bf   :  { %v1344_v49 = vpop.f32.mrf.mxu0 }
 0x3c0   :  { %v1345_v18 = vadd.f32 %v1579_v1, %v1344_v49 }
 0x3c1   :  { %v1762_v34 = vpop.f32.mrf.mxu0 }
 0x3c2   :  { %1370 = vst [vmem:[#allocation13 + $0x20] sm:$0xff] %v1345_v18 }
 0x3c3   :  { %v1347_v9 = vpop.f32.mrf.mxu0 }
 0x3c4   :  { %v1348_v39 = vadd.f32 %v1582_v55, %v1347_v9 }
 0x3c5   :  { %v1763_v2 = vpop.f32.mrf.mxu0 }
 0x3c6   :  { %1371 = vst [vmem:[#allocation13 + $0x28] sm:$0xff] %v1348_v39 }
 0x3c7   :  { %v1352_v20 = vpop.f32.mrf.mxu0 }
 0x3c8   :  { %v1353_v15 = vadd.f32 %v1585_v13, %v1352_v20 }
 0x3c9   :  { %v1766_v19 = vpop.f32.mrf.mxu0 }
 0x3ca   :  { %1372 = vst [vmem:[#allocation13 + $0x30] sm:$0xff] %v1353_v15 }
 0x3cb   :  { %v1355_v41 = vpop.f32.mrf.mxu0 }
 0x3cc   :  { %v1356_v51 = vadd.f32 %v1588_v46, %v1355_v41 }
 0x3cd   :  { %v1767_v43 = vpop.f32.mrf.mxu0 }
 0x3ce   :  { %1373 = vst [vmem:[#allocation13 + $0x38] sm:$0xff] %v1356_v51 }
 0x3cf   :  { %v1360_v10 = vpop.f32.mrf.mxu0 }
 0x3d0   :  { %v1361_v25 = vadd.f32 %v1591_v22, %v1360_v10 }
 0x3d1   :  { %v1770_v26 = vpop.f32.mrf.mxu0 }
 0x3d2   :  { %1374 = vst [vmem:[#allocation13 + $0x40] sm:$0xff] %v1361_v25 }
 0x3d3   :  { %v1363_v27 = vpop.f32.mrf.mxu0 }
 0x3d4   :  { %1975 = shalt.err (!%p1972_p6)
}
 0x3d5   :  { %1408 = dma.vmem_to_hbm [thread:$0]  %s1403_s6, 1152, %s2618_s14, [#allocation12], %s2005_s25, %s2005_s25, %s2006_s26   ;;  %v1771_v28 = vpop.f32.mrf.mxu0 }
 0x3d6   :  { %1990 = dma.done.wait [#allocation4], 128  }
 0x3d7   :  { %1991 = vsyncadd [#allocation4], 4294967168 }
 0x3d8   :  { %1992 = dma.done.wait [#allocation12], 1536  }
 0x3d9   :  { %1993 = vsyncadd [#allocation12], 4294965760 }
 0x3da   :  { %1418 = vsyncpa [#allocation3], 1 }
 0x3db   :  { %1419 = vsyncpa [#allocation6], 1 }
 0x3dc   :  { %1420 = vsyncpa [#allocation9], 1 }
 0x3dd   :  { %1421 = vsyncpa [#allocation4], 1 }
 0x3de   :  { %1422 = vsyncpa [#allocation12], 1 }

</bundles_post_ra>
